<compile_context>
chip_gen: v6e
topology: v6e:2x2x1
jax: 0.10.0
libtpu: 0.0.40
codegen_flags: <defaults>
</compile_context>

<pallas_src>
import functools

import jax
import jax.numpy as jnp
from jax import lax
from jax.experimental import pallas as pl
from jax.experimental.pallas import tpu as pltpu

NEG_INF = -1e30  # stands in for the -inf diagonal mask of CCNet's INF()


# --------------------------------------------------------------------------
# fused BN + ReLU + 3x3 conv (no bias).
# The padded input is passed row-flattened: (N, P, Cin) with P=(H+3)*(W+2)
# (one extra bottom row so every shifted slice stays in bounds).  Each of the
# nine taps is a contiguous 2-D slice of the flattened tile -> one bf16 MXU
# matmul of shape (H*(W+2), Cin) x (Cin, Cout) with f32 accumulation.
# The junk columns (w >= W) are dropped by the wrapper.
# --------------------------------------------------------------------------
def _bn_relu_conv3x3_kernel(xp_ref, scale_ref, bias_ref, mask_ref, w_ref,
                            o_ref, *, H, Wpad):
    x = xp_ref[0]                                       # (P, Cin) f32
    y = jnp.maximum(x * scale_ref[...] + bias_ref[...], 0.0)
    # conv padding must be zero AFTER the activation -> multiply by the ring mask
    y = (y * mask_ref[...]).astype(jnp.bfloat16)
    rows = H * Wpad
    cout = o_ref.shape[-1]
    acc = jnp.zeros((rows, cout), jnp.float32)
    # TODO(synk): for wide channels (Cin >= 128) collapse the 9 taps into a
    # single K=9*Cin matmul; at these channel widths (8..24) the 9 small dots
    # are not the limiter.
    for t, (dy, dx) in enumerate([(a, b) for a in range(3) for b in range(3)]):
        ofs = dy * Wpad + dx
        acc += jnp.dot(y[ofs:ofs + rows, :], w_ref[t],
                       preferred_element_type=jnp.float32)
    o_ref[0] = acc.astype(o_ref.dtype)


def _bn_fold(bn, eps=1e-5):
    scale = bn['weight'] / jnp.sqrt(bn['running_var'] + eps)
    bias = bn['bias'] - bn['running_mean'] * scale
    return scale, bias


def bn_relu_conv3x3(x_nhwc, bn, w9):
    N, H, W, C = x_nhwc.shape
    Hpad, Wpad = H + 3, W + 2              # 1px ring + 1 extra bottom row
    Cout = w9.shape[-1]
    scale, bias = _bn_fold(bn)

    xp = jnp.pad(x_nhwc, ((0, 0), (1, 2), (1, 1), (0, 0)))
    xp = xp.reshape(N, Hpad * Wpad, C)

    mask2 = jnp.zeros((Hpad, Wpad), x_nhwc.dtype).at[1:H + 1, 1:W + 1].set(1.0)
    mask = mask2.reshape(Hpad * Wpad, 1)

    out = pl.pallas_call(
        functools.partial(_bn_relu_conv3x3_kernel, H=H, Wpad=Wpad),
        out_shape=jax.ShapeDtypeStruct((N, H * Wpad, Cout), jnp.float32),
        grid=(N,),
        in_specs=[pl.BlockSpec((1, Hpad * Wpad, C), lambda n: (n, 0, 0)),
                  pl.BlockSpec((1, C), lambda n: (0, 0)),
                  pl.BlockSpec((1, C), lambda n: (0, 0)),
                  pl.BlockSpec((Hpad * Wpad, 1), lambda n: (0, 0)),
                  pl.BlockSpec((9, C, Cout), lambda n: (0, 0, 0))],
        out_specs=pl.BlockSpec((1, H * Wpad, Cout), lambda n: (n, 0, 0)),
        compiler_params=pltpu.CompilerParams(dimension_semantics=("parallel",)),
    )(xp, scale.reshape(1, C), bias.reshape(1, C), mask,
      w9.astype(jnp.bfloat16))
    # drop the 2 junk columns per row
    return out.reshape(N, H, Wpad, Cout)[:, :, :W, :]


# --------------------------------------------------------------------------
# 1x1 conv with bias == row-tiled matmul + bias (q/k/v projection, bottleneck)
# --------------------------------------------------------------------------
def _matmul_bias_kernel(x_ref, w_ref, b_ref, o_ref):
    o_ref[...] = (jnp.dot(x_ref[...].astype(jnp.bfloat16), w_ref[...],
                          preferred_element_type=jnp.float32)
                  + b_ref[...]).astype(o_ref.dtype)


def matmul_bias(x_flat, w, b, tile_m=256):
    M, Cin = x_flat.shape
    Cout = w.shape[1]
    tm = tile_m if M % tile_m == 0 else M
    return pl.pallas_call(
        _matmul_bias_kernel,
        out_shape=jax.ShapeDtypeStruct((M, Cout), jnp.float32),
        grid=(M // tm,),
        in_specs=[pl.BlockSpec((tm, Cin), lambda i: (i, 0)),
                  pl.BlockSpec((Cin, Cout), lambda i: (0, 0)),
                  pl.BlockSpec((1, Cout), lambda i: (0, 0))],
        out_specs=pl.BlockSpec((tm, Cout), lambda i: (i, 0)),
        compiler_params=pltpu.CompilerParams(dimension_semantics=("parallel",)),
    )(x_flat, w.astype(jnp.bfloat16), b.reshape(1, Cout).astype(jnp.float32))


# --------------------------------------------------------------------------
# Criss-cross attention: flash-style split joint softmax in two passes.
#
# Pass 1 (W-major layout, per image): H-axis energies (with the INF diagonal
# mask), per-pixel branch max + exp-sum, and the UNNORMALISED H-branch
# aggregation.  Only activation-sized / tiny tensors leave VMEM.
# --------------------------------------------------------------------------
def _cca_hbranch_kernel(qt_ref, kt_ref, vt_ref, mh_ref, sh_ref, oh_ref):
    qt = qt_ref[0].astype(jnp.bfloat16)       # (W, H, Cq)
    kt = kt_ref[0].astype(jnp.bfloat16)       # (W, H, Cq)
    # energy_H (transposed layout): e[w,h,g] = sum_c q[h,w,c] * k[g,w,c]
    e = jnp.einsum('whc,wgc->whg', qt, kt, preferred_element_type=jnp.float32)
    Wd, Hd = e.shape[0], e.shape[1]
    row = lax.broadcasted_iota(jnp.int32, (Wd, Hd, Hd), 1)
    col = lax.broadcasted_iota(jnp.int32, (Wd, Hd, Hd), 2)
    e = jnp.where(row == col, NEG_INF, e)     # CCNet INF() diagonal mask
    m = e.max(axis=-1, keepdims=True)         # (W, H, 1) branch max
    p = jnp.exp(e - m)
    s = p.sum(axis=-1, keepdims=True)         # (W, H, 1) branch exp-sum
    o = jnp.einsum('whg,wgc->whc', p.astype(jnp.bfloat16),
                   vt_ref[0].astype(jnp.bfloat16),
                   preferred_element_type=jnp.float32)   # unnormalised agg
    mh_ref[0] = m
    sh_ref[0] = s
    oh_ref[0] = o


# Pass 2 (H-major layout, per image): W-axis energies, joint-softmax merge with
# the pass-1 stats, both aggregations, gamma scaling and the residual add.
def _cca_wbranch_kernel(q_ref, k_ref, v_ref, x_ref, mh_ref, sh_ref, oh_ref,
                        o_ref, *, gamma):
    q = q_ref[0].astype(jnp.bfloat16)         # (H, W, Cq)
    k = k_ref[0].astype(jnp.bfloat16)
    # energy_W: e[h,w,v] = sum_c q[h,w,c] * k[h,v,c]
    e = jnp.einsum('hwc,hvc->hwv', q, k, preferred_element_type=jnp.float32)
    mh = mh_ref[0]                            # (H, W, 1) H-branch max
    m = jnp.maximum(e.max(axis=-1, keepdims=True), mh)   # joint max
    p = jnp.exp(e - m)                        # (H, W, W)
    corr = jnp.exp(mh - m)                    # rescale for the H-branch
    denom = p.sum(axis=-1, keepdims=True) + corr * sh_ref[0]
    inv = pl.reciprocal(denom, approx=True)   # EUP, off the VALU slot
    ow = jnp.einsum('hwv,hvc->hwc', p.astype(jnp.bfloat16),
                    v_ref[0].astype(jnp.bfloat16),
                    preferred_element_type=jnp.float32)
    agg = (ow + corr * oh_ref[0]) * inv       # = out_W + out_H (joint softmax)
    o_ref[0] = (gamma * agg + x_ref[0]).astype(o_ref.dtype)


def cca_apply(x_nhwc, p):
    N, H, W, C = x_nhwc.shape
    Cq = p['wq'].shape[1]
    gamma = float(p['gamma'])

    # fused q/k/v projection (row-tiled 1x1 conv)
    flat = x_nhwc.reshape(N * H * W, C)
    wqkv = jnp.concatenate([p['wq'], p['wk'], p['wv']], axis=1)
    bqkv = jnp.concatenate([p['bq'], p['bk'], p['bv']])
    qkv = matmul_bias(flat, wqkv, bqkv)
    q = qkv[:, :Cq].reshape(N, H, W, Cq)
    k = qkv[:, Cq:2 * Cq].reshape(N, H, W, Cq)
    v = qkv[:, 2 * Cq:].reshape(N, H, W, C)
    qT = jnp.transpose(q, (0, 2, 1, 3))       # layout glue only
    kT = jnp.transpose(k, (0, 2, 1, 3))
    vT = jnp.transpose(v, (0, 2, 1, 3))

    # TODO(synk): at production resolutions, row-tile these two kernels
    # (grid=(N, H//th)) and set vmem_limit_bytes explicitly for v7x (64 MiB).
    mh_t, sh_t, oh_t = pl.pallas_call(
        _cca_hbranch_kernel,
        out_shape=(jax.ShapeDtypeStruct((N, W, H, 1), jnp.float32),
                   jax.ShapeDtypeStruct((N, W, H, 1), jnp.float32),
                   jax.ShapeDtypeStruct((N, W, H, C), jnp.float32)),
        grid=(N,),
        in_specs=[pl.BlockSpec((1, W, H, Cq), lambda n: (n, 0, 0, 0)),
                  pl.BlockSpec((1, W, H, Cq), lambda n: (n, 0, 0, 0)),
                  pl.BlockSpec((1, W, H, C), lambda n: (n, 0, 0, 0))],
        out_specs=(pl.BlockSpec((1, W, H, 1), lambda n: (n, 0, 0, 0)),
                   pl.BlockSpec((1, W, H, 1), lambda n: (n, 0, 0, 0)),
                   pl.BlockSpec((1, W, H, C), lambda n: (n, 0, 0, 0))),
        compiler_params=pltpu.CompilerParams(dimension_semantics=("parallel",)),
    )(qT, kT, vT)

    # tiny stat transposes + one activation-sized transpose (glue only)
    mh = jnp.transpose(mh_t, (0, 2, 1, 3))
    sh = jnp.transpose(sh_t, (0, 2, 1, 3))
    oh = jnp.transpose(oh_t, (0, 2, 1, 3))

    out = pl.pallas_call(
        functools.partial(_cca_wbranch_kernel, gamma=gamma),
        out_shape=jax.ShapeDtypeStruct((N, H, W, C), jnp.float32),
        grid=(N,),
        in_specs=[pl.BlockSpec((1, H, W, Cq), lambda n: (n, 0, 0, 0)),
                  pl.BlockSpec((1, H, W, Cq), lambda n: (n, 0, 0, 0)),
                  pl.BlockSpec((1, H, W, C), lambda n: (n, 0, 0, 0)),
                  pl.BlockSpec((1, H, W, C), lambda n: (n, 0, 0, 0)),
                  pl.BlockSpec((1, H, W, 1), lambda n: (n, 0, 0, 0)),
                  pl.BlockSpec((1, H, W, 1), lambda n: (n, 0, 0, 0)),
                  pl.BlockSpec((1, H, W, C), lambda n: (n, 0, 0, 0))],
        out_specs=pl.BlockSpec((1, H, W, C), lambda n: (n, 0, 0, 0)),
        compiler_params=pltpu.CompilerParams(dimension_semantics=("parallel",)),
    )(q, k, v, x_nhwc, mh, sh, oh)
    return out


# --------------------------------------------------------------------------
# RCCAModule forward
# --------------------------------------------------------------------------
def rcca_forward(x_nhwc, params, recurrence=2):
    out = bn_relu_conv3x3(x_nhwc, params['bn_a'], params['conva_w9'])
    for _ in range(recurrence):
        out = cca_apply(out, params['cca'])
    out = bn_relu_conv3x3(out, params['bn_b'], params['convb_w9'])
    cat = jnp.concatenate([x_nhwc, out], axis=-1)
    y = bn_relu_conv3x3(cat, params['bn_btl'], params['btl_w9'])
    # TODO(synk): Dropout2d(0.1) is treated as identity (inference mode).
    N, H, W, Co = y.shape
    y = matmul_bias(y.reshape(N * H * W, Co), params['btl_w1'], params['btl_b1'])
    return y.reshape(N, H, W, -1)


# --------------------------------------------------------------------------
# deterministic synthetic parameters (shapes from RCCAModule.__init__)
# --------------------------------------------------------------------------
def init_params(key, in_channels, out_channels):
    inter = in_channels // 2
    cq = inter // 4           # assumed CCA reduction factor = 4
    assert cq >= 1
    keys = jax.random.split(key, 20)

    def conv_w(k, cout, cin, kh, kw):
        return 0.1 * jax.random.normal(k, (cout, cin, kh, kw), jnp.float32)

    def to_w9(w):   # (Cout, Cin, 3, 3) -> (9, Cin, Cout)
        return jnp.transpose(w, (2, 3, 1, 0)).reshape(9, w.shape[1], w.shape[0])

    def w1x1(w):    # (Cout, Cin, 1, 1) -> (Cin, Cout)
        return jnp.transpose(w[:, :, 0, 0])

    def bn_params(k, c):
        k1, k2, k3, k4 = jax.random.split(k, 4)
        return dict(weight=1.0 + 0.1 * jax.random.normal(k1, (c,), jnp.float32),
                    bias=0.1 * jax.random.normal(k2, (c,), jnp.float32),
                    running_mean=0.1 * jax.random.normal(k3, (c,), jnp.float32),
                    running_var=1.0 + 0.1 * jax.random.uniform(k4, (c,), jnp.float32))

    params = {
        'bn_a': bn_params(keys[0], in_channels),
        'conva_w9': to_w9(conv_w(keys[1], inter, in_channels, 3, 3)),
        'cca': dict(
            wq=w1x1(conv_w(keys[2], cq, inter, 1, 1)),
            bq=0.1 * jax.random.normal(keys[3], (cq,), jnp.float32),
            wk=w1x1(conv_w(keys[4], cq, inter, 1, 1)),
            bk=0.1 * jax.random.normal(keys[5], (cq,), jnp.float32),
            wv=w1x1(conv_w(keys[6], inter, inter, 1, 1)),
            bv=0.1 * jax.random.normal(keys[7], (inter,), jnp.float32),
            gamma=0.5,   # PyTorch inits gamma to 0 (identity); 0.5 exercises the path
        ),
        'bn_b': bn_params(keys[8], inter),
        'convb_w9': to_w9(conv_w(keys[9], inter, inter, 3, 3)),
        'bn_btl': bn_params(keys[10], in_channels + inter),
        'btl_w9': to_w9(conv_w(keys[11], out_channels, in_channels + inter, 3, 3)),
        'btl_w1': w1x1(conv_w(keys[12], out_channels, out_channels, 1, 1)),
        'btl_b1': 0.1 * jax.random.normal(keys[13], (out_channels,), jnp.float32),
    }
    return params


if __name__ == "__main__":
    key = jax.random.PRNGKey(0)
    kx, kp = jax.random.split(key)

    N, Cin, H, W = 2, 16, 16, 16     # PyTorch-style NCHW input shape
    Cout = 8

    x_nchw = jax.random.normal(kx, (N, Cin, H, W), jnp.float32)
    x_nhwc = jnp.transpose(x_nchw, (0, 2, 3, 1))   # boundary layout conversion

    params = init_params(kp, Cin, Cout)
    y = rcca_forward(x_nhwc, params, recurrence=2)
    y = jax.block_until_ready(y)

    assert y.shape == (N, H, W, Cout), y.shape
    assert bool(jnp.all(jnp.isfinite(y)))
    print("KERNEL_OK")
</pallas_src>

<mosaic_0001>
module attributes {stable_mosaic.version = 11 : i64} {
  func.func @_bn_relu_conv3x3_kernel(%arg0: i32, %arg1: memref<1x342x16xf32, #tpu.memory_space<vmem>>, %arg2: memref<1x16xf32, #tpu.memory_space<vmem>>, %arg3: memref<1x16xf32, #tpu.memory_space<vmem>>, %arg4: memref<342x1xf32, #tpu.memory_space<vmem>>, %arg5: memref<9x16x8xbf16, #tpu.memory_space<vmem>>, %arg6: memref<1x288x8xf32, #tpu.memory_space<vmem>>) attributes {dimension_semantics = [#tpu.dimension_semantics<parallel>], iteration_bounds = array<i64: 2>, scalar_prefetch = 0 : i64, scratch_operands = 0 : i64, tpu.core_type = #tpu.core_type<tc>, window_params = [{transform_indices = @transform_0, window_bounds = array<i64: 1, 342, 16>}, {pipeline_mode = #tpu.pipeline_mode<synchronous>, transform_indices = @transform_1, window_bounds = array<i64: 1, 16>}, {pipeline_mode = #tpu.pipeline_mode<synchronous>, transform_indices = @transform_2, window_bounds = array<i64: 1, 16>}, {pipeline_mode = #tpu.pipeline_mode<synchronous>, transform_indices = @transform_3, window_bounds = array<i64: 342, 1>}, {pipeline_mode = #tpu.pipeline_mode<synchronous>, transform_indices = @transform_4, window_bounds = array<i64: 9, 16, 8>}, {transform_indices = @transform_5, window_bounds = array<i64: 1, 288, 8>}]} {
    %c0 = arith.constant 0 : index
    %c0_0 = arith.constant 0 : index
    %c0_1 = arith.constant 0 : index
    %0 = vector.load %arg1[%c0, %c0_0, %c0_1] : memref<1x342x16xf32, #tpu.memory_space<vmem>>, vector<1x342x16xf32>
    %1 = vector.shape_cast %0 : vector<1x342x16xf32> to vector<342x16xf32>
    %c0_2 = arith.constant 0 : index
    %c0_3 = arith.constant 0 : index
    %2 = vector.load %arg2[%c0_2, %c0_3] : memref<1x16xf32, #tpu.memory_space<vmem>>, vector<1x16xf32>
    %3 = vector.broadcast %2 : vector<1x16xf32> to vector<342x16xf32>
    %4 = arith.mulf %1, %3 : vector<342x16xf32>
    %c0_4 = arith.constant 0 : index
    %c0_5 = arith.constant 0 : index
    %5 = vector.load %arg3[%c0_4, %c0_5] : memref<1x16xf32, #tpu.memory_space<vmem>>, vector<1x16xf32>
    %6 = vector.broadcast %5 : vector<1x16xf32> to vector<342x16xf32>
    %7 = arith.addf %4, %6 : vector<342x16xf32>
    %cst = arith.constant 0.000000e+00 : f32
    %8 = vector.broadcast %cst : f32 to vector<342x16xf32>
    %9 = arith.maximumf %7, %8 : vector<342x16xf32>
    %c0_6 = arith.constant 0 : index
    %c0_7 = arith.constant 0 : index
    %10 = vector.load %arg4[%c0_6, %c0_7] : memref<342x1xf32, #tpu.memory_space<vmem>>, vector<342x1xf32>
    %11 = vector.broadcast %10 : vector<342x1xf32> to vector<342x16xf32>
    %12 = arith.mulf %9, %11 : vector<342x16xf32>
    %13 = arith.truncf %12 : vector<342x16xf32> to vector<342x16xbf16>
    %cst_8 = arith.constant 0.000000e+00 : f32
    %14 = vector.broadcast %cst_8 : f32 to vector<288x8xf32>
    %15 = vector.extract_strided_slice %13 {offsets = [0, 0], sizes = [288, 16], strides = [1, 1]} : vector<342x16xbf16> to vector<288x16xbf16>
    %c0_9 = arith.constant 0 : index
    %c0_10 = arith.constant 0 : index
    %c0_11 = arith.constant 0 : index
    %16 = vector.load %arg5[%c0_9, %c0_10, %c0_11] : memref<9x16x8xbf16, #tpu.memory_space<vmem>>, vector<1x16x8xbf16>
    %17 = vector.shape_cast %16 : vector<1x16x8xbf16> to vector<16x8xbf16>
    %cst_12 = arith.constant dense<0.000000e+00> : vector<288x8xf32>
    %18 = tpu.matmul %15, %17, %cst_12 {dimension_numbers = #tpu.dot_dimension_numbers<[1], [0], [0], [1], [0, 0, 1, 1], [], []>} : vector<288x16xbf16>, vector<16x8xbf16>, vector<288x8xf32> -> vector<288x8xf32>
    %19 = arith.addf %14, %18 : vector<288x8xf32>
    %20 = vector.extract_strided_slice %13 {offsets = [1, 0], sizes = [288, 16], strides = [1, 1]} : vector<342x16xbf16> to vector<288x16xbf16>
    %c1 = arith.constant 1 : index
    %c0_13 = arith.constant 0 : index
    %c0_14 = arith.constant 0 : index
    %21 = vector.load %arg5[%c1, %c0_13, %c0_14] : memref<9x16x8xbf16, #tpu.memory_space<vmem>>, vector<1x16x8xbf16>
    %22 = vector.shape_cast %21 : vector<1x16x8xbf16> to vector<16x8xbf16>
    %cst_15 = arith.constant dense<0.000000e+00> : vector<288x8xf32>
    %23 = tpu.matmul %20, %22, %cst_15 {dimension_numbers = #tpu.dot_dimension_numbers<[1], [0], [0], [1], [0, 0, 1, 1], [], []>} : vector<288x16xbf16>, vector<16x8xbf16>, vector<288x8xf32> -> vector<288x8xf32>
    %24 = arith.addf %19, %23 : vector<288x8xf32>
    %25 = vector.extract_strided_slice %13 {offsets = [2, 0], sizes = [288, 16], strides = [1, 1]} : vector<342x16xbf16> to vector<288x16xbf16>
    %c2 = arith.constant 2 : index
    %c0_16 = arith.constant 0 : index
    %c0_17 = arith.constant 0 : index
    %26 = vector.load %arg5[%c2, %c0_16, %c0_17] : memref<9x16x8xbf16, #tpu.memory_space<vmem>>, vector<1x16x8xbf16>
    %27 = vector.shape_cast %26 : vector<1x16x8xbf16> to vector<16x8xbf16>
    %cst_18 = arith.constant dense<0.000000e+00> : vector<288x8xf32>
    %28 = tpu.matmul %25, %27, %cst_18 {dimension_numbers = #tpu.dot_dimension_numbers<[1], [0], [0], [1], [0, 0, 1, 1], [], []>} : vector<288x16xbf16>, vector<16x8xbf16>, vector<288x8xf32> -> vector<288x8xf32>
    %29 = arith.addf %24, %28 : vector<288x8xf32>
    %30 = vector.extract_strided_slice %13 {offsets = [18, 0], sizes = [288, 16], strides = [1, 1]} : vector<342x16xbf16> to vector<288x16xbf16>
    %c3 = arith.constant 3 : index
    %c0_19 = arith.constant 0 : index
    %c0_20 = arith.constant 0 : index
    %31 = vector.load %arg5[%c3, %c0_19, %c0_20] : memref<9x16x8xbf16, #tpu.memory_space<vmem>>, vector<1x16x8xbf16>
    %32 = vector.shape_cast %31 : vector<1x16x8xbf16> to vector<16x8xbf16>
    %cst_21 = arith.constant dense<0.000000e+00> : vector<288x8xf32>
    %33 = tpu.matmul %30, %32, %cst_21 {dimension_numbers = #tpu.dot_dimension_numbers<[1], [0], [0], [1], [0, 0, 1, 1], [], []>} : vector<288x16xbf16>, vector<16x8xbf16>, vector<288x8xf32> -> vector<288x8xf32>
    %34 = arith.addf %29, %33 : vector<288x8xf32>
    %35 = vector.extract_strided_slice %13 {offsets = [19, 0], sizes = [288, 16], strides = [1, 1]} : vector<342x16xbf16> to vector<288x16xbf16>
    %c4 = arith.constant 4 : index
    %c0_22 = arith.constant 0 : index
    %c0_23 = arith.constant 0 : index
    %36 = vector.load %arg5[%c4, %c0_22, %c0_23] : memref<9x16x8xbf16, #tpu.memory_space<vmem>>, vector<1x16x8xbf16>
    %37 = vector.shape_cast %36 : vector<1x16x8xbf16> to vector<16x8xbf16>
    %cst_24 = arith.constant dense<0.000000e+00> : vector<288x8xf32>
    %38 = tpu.matmul %35, %37, %cst_24 {dimension_numbers = #tpu.dot_dimension_numbers<[1], [0], [0], [1], [0, 0, 1, 1], [], []>} : vector<288x16xbf16>, vector<16x8xbf16>, vector<288x8xf32> -> vector<288x8xf32>
    %39 = arith.addf %34, %38 : vector<288x8xf32>
    %40 = vector.extract_strided_slice %13 {offsets = [20, 0], sizes = [288, 16], strides = [1, 1]} : vector<342x16xbf16> to vector<288x16xbf16>
    %c5 = arith.constant 5 : index
    %c0_25 = arith.constant 0 : index
    %c0_26 = arith.constant 0 : index
    %41 = vector.load %arg5[%c5, %c0_25, %c0_26] : memref<9x16x8xbf16, #tpu.memory_space<vmem>>, vector<1x16x8xbf16>
    %42 = vector.shape_cast %41 : vector<1x16x8xbf16> to vector<16x8xbf16>
    %cst_27 = arith.constant dense<0.000000e+00> : vector<288x8xf32>
    %43 = tpu.matmul %40, %42, %cst_27 {dimension_numbers = #tpu.dot_dimension_numbers<[1], [0], [0], [1], [0, 0, 1, 1], [], []>} : vector<288x16xbf16>, vector<16x8xbf16>, vector<288x8xf32> -> vector<288x8xf32>
    %44 = arith.addf %39, %43 : vector<288x8xf32>
    %45 = vector.extract_strided_slice %13 {offsets = [36, 0], sizes = [288, 16], strides = [1, 1]} : vector<342x16xbf16> to vector<288x16xbf16>
    %c6 = arith.constant 6 : index
    %c0_28 = arith.constant 0 : index
    %c0_29 = arith.constant 0 : index
    %46 = vector.load %arg5[%c6, %c0_28, %c0_29] : memref<9x16x8xbf16, #tpu.memory_space<vmem>>, vector<1x16x8xbf16>
    %47 = vector.shape_cast %46 : vector<1x16x8xbf16> to vector<16x8xbf16>
    %cst_30 = arith.constant dense<0.000000e+00> : vector<288x8xf32>
    %48 = tpu.matmul %45, %47, %cst_30 {dimension_numbers = #tpu.dot_dimension_numbers<[1], [0], [0], [1], [0, 0, 1, 1], [], []>} : vector<288x16xbf16>, vector<16x8xbf16>, vector<288x8xf32> -> vector<288x8xf32>
    %49 = arith.addf %44, %48 : vector<288x8xf32>
    %50 = vector.extract_strided_slice %13 {offsets = [37, 0], sizes = [288, 16], strides = [1, 1]} : vector<342x16xbf16> to vector<288x16xbf16>
    %c7 = arith.constant 7 : index
    %c0_31 = arith.constant 0 : index
    %c0_32 = arith.constant 0 : index
    %51 = vector.load %arg5[%c7, %c0_31, %c0_32] : memref<9x16x8xbf16, #tpu.memory_space<vmem>>, vector<1x16x8xbf16>
    %52 = vector.shape_cast %51 : vector<1x16x8xbf16> to vector<16x8xbf16>
    %cst_33 = arith.constant dense<0.000000e+00> : vector<288x8xf32>
    %53 = tpu.matmul %50, %52, %cst_33 {dimension_numbers = #tpu.dot_dimension_numbers<[1], [0], [0], [1], [0, 0, 1, 1], [], []>} : vector<288x16xbf16>, vector<16x8xbf16>, vector<288x8xf32> -> vector<288x8xf32>
    %54 = arith.addf %49, %53 : vector<288x8xf32>
    %55 = vector.extract_strided_slice %13 {offsets = [38, 0], sizes = [288, 16], strides = [1, 1]} : vector<342x16xbf16> to vector<288x16xbf16>
    %c8 = arith.constant 8 : index
    %c0_34 = arith.constant 0 : index
    %c0_35 = arith.constant 0 : index
    %56 = vector.load %arg5[%c8, %c0_34, %c0_35] : memref<9x16x8xbf16, #tpu.memory_space<vmem>>, vector<1x16x8xbf16>
    %57 = vector.shape_cast %56 : vector<1x16x8xbf16> to vector<16x8xbf16>
    %cst_36 = arith.constant dense<0.000000e+00> : vector<288x8xf32>
    %58 = tpu.matmul %55, %57, %cst_36 {dimension_numbers = #tpu.dot_dimension_numbers<[1], [0], [0], [1], [0, 0, 1, 1], [], []>} : vector<288x16xbf16>, vector<16x8xbf16>, vector<288x8xf32> -> vector<288x8xf32>
    %59 = arith.addf %54, %58 : vector<288x8xf32>
    %c0_37 = arith.constant 0 : index
    %c0_38 = arith.constant 0 : index
    %c0_39 = arith.constant 0 : index
    %60 = vector.load %arg6[%c0_37, %c0_38, %c0_39] : memref<1x288x8xf32, #tpu.memory_space<vmem>>, vector<1x288x8xf32>
    %61 = vector.shape_cast %60 : vector<1x288x8xf32> to vector<288x8xf32>
    %62 = vector.shape_cast %59 : vector<288x8xf32> to vector<1x288x8xf32>
    tpu.vector_store %arg6[%c0_37, %c0_38, %c0_39], %62 {strides = array<i32>} : memref<1x288x8xf32, #tpu.memory_space<vmem>>, vector<1x288x8xf32>,
    return
  }
  func.func @transform_0(%arg0: i32) -> (i32, i32, i32) {
    %c0_i32 = arith.constant 0 : i32
    %c0_i32_0 = arith.constant 0 : i32
    %c0_i32_1 = arith.constant 0 : i32
    return %arg0, %c0_i32, %c0_i32_0 : i32, i32, i32
  }
  func.func @transform_1(%arg0: i32) -> (i32, i32) {
    %c0_i32 = arith.constant 0 : i32
    %c0_i32_0 = arith.constant 0 : i32
    %c0_i32_1 = arith.constant 0 : i32
    return %c0_i32, %c0_i32_0 : i32, i32
  }
  func.func @transform_2(%arg0: i32) -> (i32, i32) {
    %c0_i32 = arith.constant 0 : i32
    %c0_i32_0 = arith.constant 0 : i32
    %c0_i32_1 = arith.constant 0 : i32
    return %c0_i32, %c0_i32_0 : i32, i32
  }
  func.func @transform_3(%arg0: i32) -> (i32, i32) {
    %c0_i32 = arith.constant 0 : i32
    %c0_i32_0 = arith.constant 0 : i32
    %c0_i32_1 = arith.constant 0 : i32
    return %c0_i32, %c0_i32_0 : i32, i32
  }
  func.func @transform_4(%arg0: i32) -> (i32, i32, i32) {
    %c0_i32 = arith.constant 0 : i32
    %c0_i32_0 = arith.constant 0 : i32
    %c0_i32_1 = arith.constant 0 : i32
    %c0_i32_2 = arith.constant 0 : i32
    return %c0_i32, %c0_i32_0, %c0_i32_1 : i32, i32, i32
  }
  func.func @transform_5(%arg0: i32) -> (i32, i32, i32) {
    %c0_i32 = arith.constant 0 : i32
    %c0_i32_0 = arith.constant 0 : i32
    %c0_i32_1 = arith.constant 0 : i32
    return %arg0, %c0_i32, %c0_i32_0 : i32, i32, i32
  }
}

</mosaic_0001>

<bundles_post_ra>
// kernel: tpu_custom_call.1
= control target key start
LH: loop header
LB: loop body
LE: loop exit
PB: predicated region body
PF: predicated region fallthrough
CT: control target
= control target key end

     0   :  { %s4333_s18 = smov 0   ;;  %s6122_s0 = inlined_call_operand.vmem [shape: f32[2,342,16], index: 0, kind: input, shape index: {}]   ;;  %s6123_s1 = inlined_call_operand.vmem [shape: f32[1,16], index: 1, kind: input, shape index: {}]   ;;  %s6124_s2 = inlined_call_operand.vmem [shape: f32[1,16], index: 2, kind: input, shape index: {}]   ;;  %s6125_s3 = inlined_call_operand.vmem [shape: f32[342,1], index: 3, kind: input, shape index: {}]   ;;  %s6126_s4 = inlined_call_operand.vmem [shape: bf16[9,16,8], index: 4, kind: input, shape index: {}]   ;;  %s6127_s5 = inlined_call_operand.vmem [shape: f32[2,288,8], index: 5, kind: output, shape index: {}]  }
   0x1 LB: > { %s3559_s19 = sadd.s32 4294967295, %s4300_s18   ;;  %p3563_p0 = scmp.ge.s32.totalorder %s4300_s18, 1  ;;  %s4300_s18 = sphi %s4333_s18, %s15_s18  }
   0x2   : > { %p187_p1 = scmp.lt.s32.totalorder %s4300_s18, 3 }
   0x4   : > { %p188_p2 = pnand %p3563_p0, %p187_p1 }
   0x6   : > { %191 = sbr.rel (%p188_p2) target bundleno = 711 (0x2c7), region = 40 }
   0xb   : > { %v410_v0 = vld [vmem:[%s6125_s3 + $0x10] sm:$0xff]  ;;  %v408_v1 = vld [vmem:[%s6125_s3] sm:$0xff]  ;;  %v4302_v2 = vmov 0   ;;  %v411_v3 = vld [vmem:[%s6125_s3 + $0x18] sm:$0xff]  ;;  %p215_p3 = scmp.lt.s32.totalorder %s3559_s19, 1  ;;  %vm883_vm1 = vcmask 130048  }
   0xc   : > { %4284 = vset.pattern.permute.xlu1 %v4302_v2  ;;  %4283 = vset.pattern.permute.xlu0 %v4302_v2  ;;  %v409_v4 = vld [vmem:[%s6125_s3 + $0x8] sm:$0xff]  ;;  %v412_v6 = vld [vmem:[%s6125_s3 + $0x20] sm:$0xff]  ;;  %v431_v9 = vld [vmem:[%s6125_s3 + $0xb8] sm:$0xff]  ;;  %vm728_vm0 = vsmask.f32 7424  ;;  %vm2257_vm3 = vcmask 1045504  }
   0xd   : > { %462 = vperm.xlu1 %4284, %v410_v0   ;;  %452 = vperm.xlu0 %4283, %v408_v1   ;;  %v413_v5 = vld [vmem:[%s6125_s3 + $0x28] sm:$0xff]  ;;  %v428_v8 = vld [vmem:[%s6125_s3 + $0xa0] sm:$0xff]  ;;  %v430_v10 = vld [vmem:[%s6125_s3 + $0xb0] sm:$0xff]  ;;  %s6304_s19 = smov (!%p215_p3, %s3559_s19), 1  ;;  %vm1898_vm2 = vsmask.f32 6400 }
   0xe   : > { %v429_v7 = vld [vmem:[%s6125_s3 + $0xa8] sm:$0xff]  ;;  %v415_v12 = vld [vmem:[%s6125_s3 + $0x38] sm:$0xff]  ;;  %v414_v13 = vld [vmem:[%s6125_s3 + $0x30] sm:$0xff]  ;;  %s4272_s13 = smul.u32 344, %s6304_s19  ;;  %vm1356_vm4 = vcmask 1046528   ;;  %vm3156_vm5 = vcmask 1044480  }
   0xf   : > { %v4285_v11 = vld [vmem:[%s6126_s4 + $0x8] sm:$0xff]   ;;  %v432_v15 = vld [vmem:[%s6125_s3 + $0xc0] sm:$0xff]  ;;  %v435_v18 = vld [vmem:[%s6125_s3 + $0xd8] sm:$0xff]  ;;  %vm2799_vm6 = vsmask.f32 5376  ;;  %vm3467_vm7 = vcmask 64512  }
  0x10   : > { %3928 = vmatprep.subr.bf16.mxu0 %v4285_v11  ;;  %4270 = vmatprep.subr.bf16.mxu1 %v4285_v11  ;;  %v433_v14 = vld [vmem:[%s6125_s3 + $0xc8] sm:$0xff]  ;;  %v416_v17 = vld [vmem:[%s6125_s3 + $0x40] sm:$0xff]  ;;  %v434_v19 = vld [vmem:[%s6125_s3 + $0xd0] sm:$0xff]  ;;  %s4461_s24 = scalar_lea.vmem %s6122_s0, %s4272_s13  ;;  %s4273_s13 = smul.u32 288, %s6304_s19 }
  0x11   : > { %467 = vperm.xlu1 %4284, %v411_v3   ;;  %457 = vperm.xlu0 %4283, %v409_v4   ;;  %v417_v16 = vld [vmem:[%s6125_s3 + $0x48] sm:$0xff]  ;;  %v419_v20 = vld [vmem:[%s6125_s3 + $0x58] sm:$0xff]  ;;  %v418_v21 = vld [vmem:[%s6125_s3 + $0x50] sm:$0xff] }
  0x12   : > { %3929 = vmatpush3.bf16.msra.mxu0 %v4285_v11  ;;  %4271 = vmatpush3.bf16.msra.mxu1 %v4285_v11  ;;  %v437_v22 = vld [vmem:[%s6125_s3 + $0xe8] sm:$0xff]  ;;  %v436_v23 = vld [vmem:[%s6125_s3 + $0xe0] sm:$0xff]  ;;  %v439_v26 = vld [vmem:[%s6125_s3 + $0xf8] sm:$0xff]  ;;  %s6010_s16 = scalar_lea.vmem %s6127_s5, %s4273_s13 }
  0x13   : > { %v421_v24 = vld [vmem:[%s6125_s3 + $0x68] sm:$0xff]  ;;  %v420_v25 = vld [vmem:[%s6125_s3 + $0x60] sm:$0xff]  ;;  %v438_v27 = vld [vmem:[%s6125_s3 + $0xf0] sm:$0xff] }
  0x14   : > { %v4427_v28 = vld [vmem:[%s6126_s4 + $0x10] sm:$0xff]   ;;  %v423_v29 = vld [vmem:[%s6125_s3 + $0x78] sm:$0xff]  ;;  %v441_v31 = vld [vmem:[%s6125_s3 + $0x108] sm:$0xff] }
  0x15   : > { %477 = vperm.xlu1 %4284, %v413_v5   ;;  %472 = vperm.xlu0 %4283, %v412_v6   ;;  %v422_v30 = vld [vmem:[%s6125_s3 + $0x70] sm:$0xff]  ;;  %v440_v32 = vld [vmem:[%s6125_s3 + $0x100] sm:$0xff]  ;;  %v425_v34 = vld [vmem:[%s6125_s3 + $0x88] sm:$0xff] }
  0x16   : > { %4004 = vmatprep.subr.bf16.mxu0 %v4427_v28  ;;  %v4450_v33 = vld [vmem:[%s6126_s4] sm:$0xff]   ;;  %v245_v37 = vld [vmem:[%s4461_s24 + $0x98] sm:$0xff]  ;;  %v244_v38 = vld [vmem:[%s4461_s24 + $0x90] sm:$0xff] }
  0x17   : > { %v424_v35 = vld [vmem:[%s6125_s3 + $0x80] sm:$0xff]  ;;  %3966 = vmatprep.subr.bf16.mxu1 %v4450_v33  ;;  %v443_v42 = vld [vmem:[%s6125_s3 + $0x118] sm:$0xff]  ;;  %v442_v43 = vld [vmem:[%s6125_s3 + $0x110] sm:$0xff] }
  0x18   : > { %v4467_v36 = vld [vmem:[%s6123_s1] ss:$0 sm:$0xff]  ;;  %v263_v46 = vld [vmem:[%s4461_s24 + $0x128] sm:$0xff]  ;;  %v427_v50 = vld [vmem:[%s6125_s3 + $0x98] sm:$0xff] }
  0x19   : > { %557 = vperm.xlu1 %4284, %v429_v7   ;;  %552 = vperm.xlu0 %4283, %v428_v8   ;;  %v294_v39 = vmul.f32 %v4467_v36, %v245_v37  ;;  %v293_v40 = vmul.f32 %v4467_v36, %v244_v38  ;;  %v4476_v41 = vld [vmem:[%s6124_s2] ss:$0 sm:$0xff]  ;;  %v312_v48 = vmul.f32 %v4467_v36, %v263_v46  ;;  %v426_v51 = vld [vmem:[%s6125_s3 + $0x90] sm:$0xff]  ;;  %v265_v54 = vld [vmem:[%s4461_s24 + $0x138] sm:$0xff] }
  0x1a   : > { %v262_v47 = vld [vmem:[%s4461_s24 + $0x120] sm:$0xff]  ;;  %v264_v55 = vld [vmem:[%s4461_s24 + $0x130] sm:$0xff]  ;;  %v314_v56 = vmul.f32 %v4467_v36, %v265_v54  ;;  %v445_v58 = vld [vmem:[%s6125_s3 + $0x128] sm:$0xff] }
  0x1b   : > { %v4485_v44 = vadd.f32 %v4476_v41, %v294_v39  ;;  %v4488_v45 = vadd.f32 %v4476_v41, %v293_v40  ;;  %v311_v49 = vmul.f32 %v4467_v36, %v262_v47  ;;  %v4501_v52 = vadd.f32 %v4476_v41, %v312_v48  ;;  %v444_v59 = vld [vmem:[%s6125_s3 + $0x120] sm:$0xff]  ;;  %v267_v62 = vld [vmem:[%s4461_s24 + $0x148] sm:$0xff]  ;;  %v447_v2 = vld [vmem:[%s6125_s3 + $0x138] sm:$0xff] }
  0x1c   : > { %v313_v57 = vmul.f32 %v4467_v36, %v264_v55  ;;  %v4517_v60 = vadd.f32 %v4476_v41, %v314_v56  ;;  %v266_v63 = vld [vmem:[%s4461_s24 + $0x140] sm:$0xff]  ;;  %v316_v0 = vmul.f32 %v4467_v36, %v267_v62  ;;  %v446_v3 = vld [vmem:[%s6125_s3 + $0x130] sm:$0xff]  ;;  %v449_v6 = vld [vmem:[%s6125_s3 + $0x148] sm:$0xff] }
  0x1d   : > { %567 = vperm.xlu1 %4284, %v431_v9   ;;  %562 = vperm.xlu0 %4283, %v430_v10   ;;  %v4504_v53 = vadd.f32 %v4476_v41, %v311_v49  ;;  %v315_v1 = vmul.f32 %v4467_v36, %v266_v63  ;;  %v448_v7 = vld [vmem:[%s6125_s3 + $0x140] sm:$0xff]  ;;  %v228_v8 = vld [vmem:[%s4461_s24 + $0x10] sm:$0xff]  ;;  %v229_v10 = vld [vmem:[%s4461_s24 + $0x18] sm:$0xff] }
  0x1e   : > { %v4520_v61 = vadd.f32 %v4476_v41, %v313_v57  ;;  %v4533_v4 = vadd.f32 %v4476_v41, %v316_v0  ;;  %v226_v9 = vld [vmem:[%s4461_s24] sm:$0xff]  ;;  %v227_v11 = vld [vmem:[%s4461_s24 + $0x8] sm:$0xff] }
  0x1f   : > { %v4536_v5 = vadd.f32 %v4476_v41, %v315_v1  ;;  %v251_v49 = vld [vmem:[%s4461_s24 + $0xc8] sm:$0xff] }
  0x21   : > { %487 = vperm.xlu1 %4284, %v415_v12   ;;  %482 = vperm.xlu0 %4283, %v414_v13   ;;  %v231_v12 = vld [vmem:[%s4461_s24 + $0x28] sm:$0xff]  ;;  %v230_v13 = vld [vmem:[%s4461_s24 + $0x20] sm:$0xff] }
  0x25   : > { %577 = vperm.xlu1 %4284, %v433_v14   ;;  %572 = vperm.xlu0 %4283, %v432_v15   ;;  %v277_v14 = vmul.f32 %v4467_v36, %v228_v8  ;;  %v275_v15 = vmul.f32 %v4467_v36, %v226_v9 }
  0x29   : > { %497 = vperm.xlu1 %4284, %v417_v16   ;;  %492 = vperm.xlu0 %4283, %v416_v17   ;;  %v278_v16 = vmul.f32 %v4467_v36, %v229_v10  ;;  %v276_v17 = vmul.f32 %v4467_v36, %v227_v11 }
  0x2d   : > { %587 = vperm.xlu1 %4284, %v435_v18   ;;  %582 = vperm.xlu0 %4283, %v434_v19   ;;  %v280_v18 = vmul.f32 %v4467_v36, %v231_v12  ;;  %v279_v19 = vmul.f32 %v4467_v36, %v230_v13 }
  0x31   : > { %507 = vperm.xlu1 %4284, %v419_v20   ;;  %502 = vperm.xlu0 %4283, %v418_v21   ;;  %v247_v20 = vld [vmem:[%s4461_s24 + $0xa8] sm:$0xff]  ;;  %v246_v21 = vld [vmem:[%s4461_s24 + $0xa0] sm:$0xff] }
  0x35   : > { %597 = vperm.xlu1 %4284, %v437_v22   ;;  %592 = vperm.xlu0 %4283, %v436_v23   ;;  %v249_v22 = vld [vmem:[%s4461_s24 + $0xb8] sm:$0xff]  ;;  %v326_v23 = vadd.f32 %v4476_v41, %v277_v14 }
  0x39   : > { %517 = vperm.xlu1 %4284, %v421_v24   ;;  %512 = vperm.xlu0 %4283, %v420_v25   ;;  %v324_v24 = vadd.f32 %v4476_v41, %v275_v15  ;;  %v327_v25 = vadd.f32 %v4476_v41, %v278_v16  ;;  %v234_v16 = vld [vmem:[%s4461_s24 + $0x40] sm:$0xff] }
  0x3b   : > { %v366_v46 = vmax.f32 %v324_v24, 0.0  ;;  %v369_v47 = vmax.f32 %v327_v25, 0.0 }
  0x3d   : > { %607 = vperm.xlu1 %4284, %v439_v26   ;;  %602 = vperm.xlu0 %4283, %v438_v27   ;;  %v325_v26 = vadd.f32 %v4476_v41, %v276_v17  ;;  %v248_v27 = vld [vmem:[%s4461_s24 + $0xb0] sm:$0xff] }
  0x3e   : > { %v297_v39 = vmul.f32 %v4467_v36, %v248_v27  ;;  %v253_v27 = vld [vmem:[%s4461_s24 + $0xd8] sm:$0xff] }
  0x3f   : > { %v367_v48 = vmax.f32 %v325_v26, 0.0 }
  0x40   : > { %v4583_v0 = vadd.f32 %v4476_v41, %v297_v39  ;;  %v252_v39 = vld [vmem:[%s4461_s24 + $0xd0] sm:$0xff] }
  0x41   : > { %527 = vperm.xlu1 %4284, %v423_v29   ;;  %522 = vperm.xlu0 %4283, %v422_v30   ;;  %v233_v29 = vld [vmem:[%s4461_s24 + $0x38] sm:$0xff]  ;;  %v329_v30 = vadd.f32 %v4476_v41, %v280_v18 }
  0x42   : > { %v282_v40 = vmul.f32 %v4467_v36, %v233_v29 }
  0x44   : > { %v4586_v1 = vadd.f32 %v4476_v41, %v282_v40 }
  0x45   : > { %617 = vperm.xlu1 %4284, %v441_v31   ;;  %612 = vperm.xlu0 %4283, %v440_v32   ;;  %v296_v31 = vmul.f32 %v4467_v36, %v247_v20  ;;  %v328_v32 = vadd.f32 %v4476_v41, %v279_v19  ;;  %v388_v20 = vmax.f32 %v4583_v0, 0.0 }
  0x46   : > { %v373_v26 = vmax.f32 %v4586_v1, 0.0 }
  0x47   : > { %v345_v54 = vadd.f32 %v4476_v41, %v296_v31  ;;  %v370_v55 = vmax.f32 %v328_v32, 0.0  ;;  %v283_v32 = vmul.f32 %v4467_v36, %v234_v16 }
  0x49   : > { %537 = vperm.xlu1 %4284, %v425_v34   ;;  %532 = vperm.xlu0 %4283, %v424_v35   ;;  %v295_v34 = vmul.f32 %v4467_v36, %v246_v21  ;;  %v298_v35 = vmul.f32 %v4467_v36, %v249_v22  ;;  %v387_v10 = vmax.f32 %v345_v54, 0.0 }
  0x4b   : > { %v344_v56 = vadd.f32 %v4476_v41, %v295_v34  ;;  %v4578_v57 = vadd.f32 %v4476_v41, %v298_v35 }
  0x4d   : > { %627 = vperm.xlu1 %4284, %v443_v42   ;;  %622 = vperm.xlu0 %4283, %v442_v43   ;;  %v232_v42 = vld [vmem:[%s4461_s24 + $0x30] sm:$0xff]  ;;  %v368_v43 = vmax.f32 %v326_v23, 0.0  ;;  %v386_v14 = vmax.f32 %v344_v56, 0.0  ;;  %v389_v19 = vmax.f32 %v4578_v57, 0.0 }
  0x4e   : > { %v236_v56 = vld [vmem:[%s4461_s24 + $0x50] sm:$0xff] }
  0x51   : > { %547 = vperm.xlu1 %4284, %v427_v50   ;;  %542 = vperm.xlu0 %4283, %v426_v51   ;;  %v250_v50 = vld [vmem:[%s4461_s24 + $0xc0] sm:$0xff]  ;;  %v371_v51 = vmax.f32 %v329_v30, 0.0 }
  0x55   : > { %637 = vperm.xlu1 %4284, %v445_v58   ;;  %632 = vperm.xlu0 %4283, %v444_v59   ;;  %v281_v58 = vmul.f32 %v4467_v36, %v232_v42  ;;  %v235_v59 = vld [vmem:[%s4461_s24 + $0x48] sm:$0xff] }
  0x56   : > { %v284_v11 = vmul.f32 %v4467_v36, %v235_v59  ;;  %v301_v59 = vmul.f32 %v4467_v36, %v252_v39 }
  0x57   : > { %v4596_v15 = vadd.f32 %v4476_v41, %v281_v58 }
  0x58   : > { %v4613_v31 = vadd.f32 %v4476_v41, %v284_v11  ;;  %v4643_v11 = vld [vmem:[%s6126_s4 + $0x20] sm:$0xff]  }
  0x59   : > { %647 = vperm.xlu1 %4284, %v447_v2   ;;  %642 = vperm.xlu0 %4283, %v446_v3   ;;  %v300_v2 = vmul.f32 %v4467_v36, %v251_v49  ;;  %v299_v3 = vmul.f32 %v4467_v36, %v250_v50 }
  0x5b   : > { %v4602_v21 = vadd.f32 %v4476_v41, %v300_v2  ;;  %v4605_v22 = vadd.f32 %v4476_v41, %v299_v3 }
  0x5d   : > { %657 = vperm.xlu1 %4284, %v449_v6   ;;  %652 = vperm.xlu0 %4283, %v448_v7  }
  0x88   : > { %v463_v37 = vpop.permute.xlu1 %462  ;;  %v453_v38 = vpop.permute.xlu0 %452 }
  0x89   : > { %v662_v6 = vmul.f32 %v463_v37, %v368_v43  ;;  %v660_v7 = vmul.f32 %v453_v38, %v366_v46  ;;  %v372_v38 = vmax.f32 %v4596_v15, 0.0 }
  0x8c   : > { %v468_v62 = vpop.permute.xlu1 %467  ;;  %v458_v63 = vpop.permute.xlu0 %457 }
  0x8d   : > { %v663_v8 = vmul.f32 %v468_v62, %v369_v47  ;;  %v661_v9 = vmul.f32 %v458_v63, %v367_v48  ;;  %v302_v47 = vmul.f32 %v4467_v36, %v253_v27 }
  0x8f   : > { %v4591_v12 = vpack.c.bf16 %v663_v8, %v662_v6  ;;  %v4593_v13 = vpack.c.bf16 %v661_v9, %v660_v7  ;;  %v391_v8 = vmax.f32 %v4602_v21, 0.0  ;;  %v255_v21 = vld [vmem:[%s4461_s24 + $0xe8] sm:$0xff] }
  0x90   : > { %v478_v17 = vpop.permute.xlu1 %477  ;;  %v473_v18 = vpop.permute.xlu0 %472 }
  0x91   : > { %v665_v23 = vmul.f32 %v478_v17, %v371_v51  ;;  %v664_v24 = vmul.f32 %v473_v18, %v370_v55  ;;  %v732_v25 = vshll.u32 %v4593_v13, 16  ;;  %v737_v29 = vshll.u32 %v4591_v12, 16  ;;  %v237_v55 = vld [vmem:[%s4461_s24 + $0x58] sm:$0xff] }
  0x92   : > { %v741_v30 = vshrl.u32 %v4591_v12, 16  ;;  %v730_v35 = vshrl.u32 %v4593_v13, 16  ;;  %v286_v9 = vmul.f32 %v4467_v36, %v237_v55 }
  0x93   : > { %v4616_v34 = vpack.c.bf16 %v665_v23, %v664_v24  ;;  %v734_v37 = vrot.slane %v732_v25, 1  ;;  %v739_v43 = vrot.slane %v737_v29, 1  ;;  %v1900_v46 = vrot.slane %v737_v29, 2 }
  0x94   : > { %v558_v40 = vpop.permute.xlu1 %557  ;;  %v553_v42 = vpop.permute.xlu0 %552  ;;  %v1899_v48 = vrot.slane %v741_v30, 1  ;;  %v390_v23 = vmax.f32 %v4605_v22, 0.0  ;;  %v375_v24 = vmax.f32 %v4613_v31, 0.0  ;;  %v332_v25 = vadd.f32 %v4476_v41, %v283_v32 }
  0x95   : > { %v681_v49 = vmul.f32 %v558_v40, %v387_v10  ;;  %v680_v50 = vmul.f32 %v553_v42, %v386_v14  ;;  %v735_v51 = vor.u32 %v734_v37, %v730_v35  ;;  %v4623_v54 = vshll.u32 %v4616_v34, 16  ;;  %v254_v35 = vld [vmem:[%s4461_s24 + $0xe0] sm:$0xff]  ;;  %v239_v37 = vld [vmem:[%s4461_s24 + $0x68] sm:$0xff] }
  0x96   : > { %v743_v57 = vor.u32 %v741_v30, %v739_v43  ;;  %v4628_v58 = vshrl.u32 %v4616_v34, 16  ;;  %v1901_v62 = vor.u32 %v1900_v46, %v1899_v48  ;;  %v285_v10 = vmul.f32 %v4467_v36, %v236_v56 }
  0x97   : > { %v4631_v63 = vpack.c.bf16 %v681_v49, %v680_v50  ;;  %v740_v0 = vsel %vm728_vm0, %v735_v51, %v739_v43  ;;  %v747_v2 = vrot.slane %v4623_v54, 1  ;;  %v1903_v3 = vrot.slane %v4623_v54, 2 }
  0x98   : > { %v568_v6 = vpop.permute.xlu1 %567  ;;  %v563_v7 = vpop.permute.xlu0 %562  ;;  %3930 = vmatprep.mubr.msk.bf16.mxu0 %vm883_vm1, %v740_v0  ;;  %v1902_v14 = vrot.slane %v4628_v58, 1  ;;  %v4663_v29 = vadd.f32 %v4476_v41, %v302_v47  ;;  %v4666_v30 = vadd.f32 %v4476_v41, %v301_v59  ;;  %v4672_v32 = vadd.f32 %v4476_v41, %v286_v9 }
  0x99   : > { %6173 = vst [vmem:[#allocation2_spill] sm:$0xff] %v4631_v63  ;;  %v683_v15 = vmul.f32 %v568_v6, %v389_v19  ;;  %v682_v16 = vmul.f32 %v563_v7, %v388_v20  ;;  %v748_v17 = vsel %vm728_vm0, %v743_v57, %v747_v2  ;;  %v4650_v18 = vshll.u32 %v4631_v63, 16  ;;  %v257_v7 = vld [vmem:[%s4461_s24 + $0xf8] sm:$0xff] }
  0x9a   : > { %3931 = vmatmul.mubr.msk.bf16.vlgmr.msra.gmra.mxu0 %vm883_vm1, %v748_v17  ;;  %v4657_v27 = vor.u32 %v1903_v3, %v1902_v14  ;;  %v4675_v39 = vadd.f32 %v4476_v41, %v285_v10  ;;  %v304_v40 = vmul.f32 %v4467_v36, %v255_v21  ;;  %v4686_v46 = vshrl.u32 %v4631_v63, 16 }
  0x9b   : > { %v4659_v19 = vpack.c.bf16 %v683_v15, %v682_v16  ;;  %v6128_v20 = vrot.slane %v4650_v18, 1  ;;  %4005 = vmatpush3.bf16.msra.mxu0 %v4427_v28  ;;  %v374_v48 = vmax.f32 %v332_v25, 0.0  ;;  %v303_v49 = vmul.f32 %v4467_v36, %v254_v35 }
  0x9c   : > { %v488_v22 = vpop.permute.xlu1 %487  ;;  %v483_v31 = vpop.permute.xlu0 %482  ;;  %4080 = vmatprep.subr.bf16.mxu0 %v4643_v11  ;;  %v4681_v42 = vsel %vm1898_vm2, %v1901_v62, %v4657_v27  ;;  %6176 = vst [vmem:[#allocation5_spill] sm:$0xff] %v4686_v46  ;;  %v288_v50 = vmul.f32 %v4467_v36, %v239_v37  ;;  %v2800_v51 = vrot.slane %v4628_v58, 2  ;;  %v2801_v56 = vrot.slane %v4623_v54, 3 }
  0x9d   : > { %6174 = vst [vmem:[#allocation3_spill] sm:$0xff] %v4659_v19  ;;  %6175 = vst [vmem:[#allocation4_spill] sm:$0xff] %v4681_v42  ;;  %v667_v28 = vmul.f32 %v488_v22, %v373_v26  ;;  %v666_v43 = vmul.f32 %v483_v31, %v372_v38  ;;  %v4689_v47 = vshll.u32 %v4659_v19, 16  ;;  %v815_v1 = vor.u32 %v4686_v46, %v6128_v20  ;;  %v238_v38 = vld [vmem:[%s4461_s24 + $0x60] sm:$0xff]  ;;  %v260_v42 = vld [vmem:[%s4461_s24 + $0x110] sm:$0xff] }
  0x9e   : > { %v393_v62 = vmax.f32 %v4663_v29, 0.0  ;;  %v392_v0 = vmax.f32 %v4666_v30, 0.0  ;;  %v377_v3 = vmax.f32 %v4672_v32, 0.0  ;;  %v376_v6 = vmax.f32 %v4675_v39, 0.0  ;;  %v256_v30 = vld [vmem:[%s4461_s24 + $0xf0] sm:$0xff] }
  0x9f   : > { %6177 = vst [vmem:[#allocation6_spill] sm:$0xff] %v4689_v47  ;;  %v4694_v55 = vpack.c.bf16 %v667_v28, %v666_v43  ;;  %v819_v26 = vrot.slane %v4689_v47, 1  ;;  %v4709_v15 = vadd.f32 %v4476_v41, %v304_v40  ;;  %v4719_v21 = vadd.f32 %v4476_v41, %v303_v49 }
  0xa0   : > { %v578_v57 = vpop.permute.xlu1 %577  ;;  %v573_v59 = vpop.permute.xlu0 %572  ;;  %v287_v25 = vmul.f32 %v4467_v36, %v238_v38  ;;  %v306_v29 = vmul.f32 %v4467_v36, %v257_v7  ;;  %v4729_v35 = vor.u32 %v2801_v56, %v2800_v51  ;;  %v751_v31 = vor.u32 %v4628_v58, %v747_v2 }
  0xa1   : > { %v685_v9 = vmul.f32 %v578_v57, %v391_v8  ;;  %v684_v10 = vmul.f32 %v573_v59, %v390_v23  ;;  %v820_v14 = vsel %vm728_vm0, %v815_v1, %v819_v26  ;;  %v4713_v16 = vshll.u32 %v4694_v55, 16  ;;  %v241_v59 = vld [vmem:[%s4461_s24 + $0x78] sm:$0xff] }
  0xa2   : > { %3950 = vmatprep.mubr.msk.bf16.mxu1 %vm883_vm1, %v820_v14  ;;  %v4716_v17 = vshrl.u32 %v4694_v55, 16  ;;  %v4725_v23 = vadd.f32 %v4476_v41, %v288_v50  ;;  %v4738_v49 = vshrl.u32 %v4659_v19, 16  ;;  %v4745_v54 = vadd.f32 %v4476_v41, %v287_v25 }
  0xa3   : > { %v4722_v8 = vpack.c.bf16 %v685_v9, %v684_v10  ;;  %v755_v40 = vrot.slane %v4713_v16, 1  ;;  %v1907_v43 = vrot.slane %v4713_v16, 2  ;;  %v305_v58 = vmul.f32 %v4467_v36, %v256_v30 }
  0xa4   : > { %v498_v37 = vpop.permute.xlu1 %497  ;;  %v493_v22 = vpop.permute.xlu0 %492  ;;  %v1906_v28 = vrot.slane %v4716_v17, 1  ;;  %6179 = vst [vmem:[#allocation8_spill] sm:$0xff] %v4738_v49  ;;  %v823_v56 = vor.u32 %v4738_v49, %v819_v26  ;;  %v394_v10 = vmax.f32 %v4719_v21, 0.0  ;;  %v4758_v25 = vadd.f32 %v4476_v41, %v306_v29  ;;  %v4763_v26 = vld [vmem:[%s6126_s4 + $0x18] sm:$0xff]   ;;  %v242_v49 = vld [vmem:[%s4461_s24 + $0x80] sm:$0xff] }
  0xa5   : > { %6178 = vst [vmem:[#allocation7_spill] sm:$0xff] %v4722_v8  ;;  %v669_v50 = vmul.f32 %v498_v37, %v375_v24  ;;  %v668_v1 = vmul.f32 %v493_v22, %v374_v48  ;;  %v4741_v51 = vshll.u32 %v4722_v8, 16  ;;  %v756_v38 = vsel %vm728_vm0, %v751_v31, %v755_v40  ;;  %v240_v31 = vld [vmem:[%s4461_s24 + $0x70] sm:$0xff] }
  0xa6   : > { %v1908_v2 = vor.u32 %v1907_v43, %v1906_v28  ;;  %3934 = vmatprep.mubr.msk.bf16.mxu0 %vm883_vm1, %v756_v38  ;;  %v395_v48 = vmax.f32 %v4709_v15, 0.0  ;;  %v378_v29 = vmax.f32 %v4745_v54, 0.0  ;;  %v4780_v43 = vadd.f32 %v4476_v41, %v305_v58 }
  0xa7   : > { %6180 = vst [vmem:[#allocation9_spill] sm:$0xff] %v4741_v51  ;;  %v4749_v57 = vpack.c.bf16 %v669_v50, %v668_v1  ;;  %v827_v24 = vrot.slane %v4741_v51, 1  ;;  %v259_v1 = vld [vmem:[%s4461_s24 + $0x108] sm:$0xff] }
  0xa8   : > { %v588_v7 = vpop.permute.xlu1 %587  ;;  %v583_v9 = vpop.permute.xlu0 %582  ;;  %v4767_v30 = vsel %vm1898_vm2, %v4657_v27, %v1908_v2  ;;  %v290_v27 = vmul.f32 %v4467_v36, %v241_v59  ;;  %v289_v59 = vmul.f32 %v4467_v36, %v240_v31  ;;  %v308_v32 = vmul.f32 %v4467_v36, %v259_v1 }
  0xa9   : > { %6181 = vst [vmem:[#allocation10_spill] sm:$0xff] %v4767_v30  ;;  %v687_v15 = vmul.f32 %v588_v7, %v393_v62  ;;  %v686_v37 = vmul.f32 %v583_v9, %v392_v0  ;;  %v828_v22 = vsel %vm728_vm0, %v823_v56, %v827_v24  ;;  %v4771_v21 = vshll.u32 %v4749_v57, 16 }
  0xaa   : > { %3951 = vmatmul.mubr.msk.bf16.vlgmr.msra.gmra.mxu1 %vm883_vm1, %v828_v22  ;;  %v4777_v28 = vshrl.u32 %v4749_v57, 16  ;;  %v759_v0 = vor.u32 %v4716_v17, %v755_v40  ;;  %v4791_v7 = vshrl.u32 %v4722_v8, 16  ;;  %v258_v22 = vld [vmem:[%s4461_s24 + $0x100] sm:$0xff]  ;;  %v4811_v20 = vadd.f32 %v4476_v41, %v290_v27 }
  0xab   : > { %v4783_v62 = vpack.c.bf16 %v687_v15, %v686_v37  ;;  %v763_v50 = vrot.slane %v4771_v21, 1  ;;  %3967 = vmatpush3.bf16.msra.mxu1 %v4450_v33  ;;  %v1911_v38 = vrot.slane %v4771_v21, 2  ;;  %v307_v27 = vmul.f32 %v4467_v36, %v258_v22 }
  0xac   : > { %v508_v54 = vpop.permute.xlu1 %507  ;;  %v503_v56 = vpop.permute.xlu0 %502  ;;  %6183 = vst [vmem:[#allocation12_spill] sm:$0xff] %v4791_v7  ;;  %4042 = vmatprep.subr.bf16.mxu1 %v4763_v26  ;;  %v1910_v40 = vrot.slane %v4777_v28, 1  ;;  %v831_v39 = vor.u32 %v4791_v7, %v827_v24  ;;  %v4837_v22 = vadd.f32 %v4476_v41, %v308_v32  ;;  %v381_v51 = vmax.f32 %v4811_v20, 0.0 }
  0xad   : > { %6182 = vst [vmem:[#allocation11_spill] sm:$0xff] %v4783_v62  ;;  %v671_v9 = vmul.f32 %v508_v54, %v377_v3  ;;  %v670_v33 = vmul.f32 %v503_v56, %v376_v6  ;;  %v764_v15 = vsel %vm728_vm0, %v759_v0, %v763_v50  ;;  %v4803_v37 = vshll.u32 %v4783_v62, 16 }
  0xae   : > { %3935 = vmatmul.mubr.msk.bf16.gmra.mxu0 %vm883_vm1, %v764_v15  ;;  %v4808_v31 = vshrl.u32 %v4783_v62, 16  ;;  %v1912_v3 = vor.u32 %v1911_v38, %v1910_v40  ;;  %v4820_v15 = vadd.f32 %v4476_v41, %v289_v59  ;;  %v396_v59 = vmax.f32 %v4780_v43, 0.0 }
  0xaf   : > { %v4814_v54 = vpack.c.bf16 %v671_v9, %v670_v33  ;;  %v835_v6 = vrot.slane %v4803_v37, 1  ;;  %v1947_v0 = vrot.slane %v4803_v37, 2  ;;  %v4850_v32 = vadd.f32 %v4476_v41, %v307_v27 }
  0xb0   : > { %v598_v56 = vpop.permute.xlu1 %597  ;;  %v593_v58 = vpop.permute.xlu0 %592  ;;  %v4824_v14 = vsel %vm1898_vm2, %v1908_v2, %v1912_v3  ;;  %v1946_v1 = vrot.slane %v4808_v31, 1  ;;  %v380_v7 = vmax.f32 %v4820_v15, 0.0  ;;  %v399_v20 = vmax.f32 %v4837_v22, 0.0 }
  0xb1   : > { %6184 = vst [vmem:[#allocation13_spill] sm:$0xff] %v4824_v14  ;;  %v689_v38 = vmul.f32 %v598_v56, %v395_v48  ;;  %v688_v40 = vmul.f32 %v593_v58, %v394_v10  ;;  %v836_v24 = vsel %vm728_vm0, %v831_v39, %v835_v6  ;;  %v4829_v9 = vshll.u32 %v4814_v54, 16  ;;  %v243_v39 = vld [vmem:[%s4461_s24 + $0x88] sm:$0xff] }
  0xb2   : > { %3954 = vmatprep.mubr.msk.bf16.mxu1 %vm883_vm1, %v836_v24  ;;  %v4834_v33 = vshrl.u32 %v4814_v54, 16  ;;  %v4839_v2 = vor.u32 %v1947_v0, %v1946_v1  ;;  %v767_v10 = vor.u32 %v4777_v28, %v763_v50  ;;  %v6187_v1 = vmax.f32 %v4725_v23, 0.0 }
  0xb3   : > { %v4841_v48 = vpack.c.bf16 %v689_v38, %v688_v40  ;;  %v771_v58 = vrot.slane %v4829_v9, 1  ;;  %v1915_v56 = vrot.slane %v4829_v9, 2  ;;  %v292_v27 = vmul.f32 %v4467_v36, %v243_v39 }
  0xb4   : > { %6185 = vst [vmem:[#allocation14_spill] sm:$0xff] %v4839_v2  ;;  %v518_v24 = vpop.permute.xlu1 %517  ;;  %v513_v43 = vpop.permute.xlu0 %512  ;;  %v1914_v0 = vrot.slane %v4834_v33, 1  ;;  %v398_v22 = vmax.f32 %v4850_v32, 0.0  ;;  %v291_v14 = vmul.f32 %v4467_v36, %v242_v49 }
  0xb5   : > { %6186 = vst [vmem:[#allocation15_spill] sm:$0xff] %v4841_v48  ;;  %v673_v50 = vmul.f32 %v518_v24, %v6187_v1  ;;  %v672_v38 = vmul.f32 %v513_v43, %v378_v29  ;;  %v772_v40 = vsel %vm728_vm0, %v767_v10, %v771_v58  ;;  %v4857_v47 = vshll.u32 %v4841_v48, 16  ;;  %v261_v24 = vld [vmem:[%s4461_s24 + $0x118] sm:$0xff] }
  0xb6   : > { %3938 = vmatprep.mubr.msk.bf16.mxu0 %vm883_vm1, %v772_v40  ;;  %v4863_v15 = vshrl.u32 %v4841_v48, 16  ;;  %v1916_v46 = vor.u32 %v1915_v56, %v1914_v0  ;;  %v839_v29 = vor.u32 %v4808_v31, %v835_v6  ;;  %v6189_v56 = vmax.f32 %v4758_v25, 0.0 }
  0xb7   : > { %v4866_v23 = vpack.c.bf16 %v673_v50, %v672_v38  ;;  %v843_v10 = vrot.slane %v4857_v47, 1  ;;  %v1951_v43 = vrot.slane %v4857_v47, 2  ;;  %v341_v32 = vadd.f32 %v4476_v41, %v292_v27 }
  0xb8   : > { %v608_v1 = vpop.permute.xlu1 %607  ;;  %v603_v40 = vpop.permute.xlu0 %602  ;;  %v4875_v30 = vsel %vm1898_vm2, %v1912_v3, %v1916_v46  ;;  %v1950_v39 = vrot.slane %v4863_v15, 1  ;;  %v310_v3 = vmul.f32 %v4467_v36, %v261_v24  ;;  %v775_v25 = vor.u32 %v4834_v33, %v771_v58 }
  0xb9   : > { %6188 = vst [vmem:[#allocation16_spill] sm:$0xff] %v4875_v30  ;;  %v691_v0 = vmul.f32 %v608_v1, %v6189_v56  ;;  %v690_v6 = vmul.f32 %v603_v40, %v396_v59  ;;  %v844_v50 = vsel %vm728_vm0, %v839_v29, %v843_v10  ;;  %v4882_v38 = vshll.u32 %v4866_v23, 16 }
  0xba   : > { %3955 = vmatmul.mubr.msk.bf16.gmra.mxu1 %vm883_vm1, %v844_v50  ;;  %v4888_v49 = vshrl.u32 %v4866_v23, 16  ;;  %v1952_v30 = vor.u32 %v1951_v43, %v1950_v39  ;;  %v340_v56 = vadd.f32 %v4476_v41, %v291_v14  ;;  %v309_v27 = vmul.f32 %v4467_v36, %v260_v42 }
  0xbb   : > { %v4891_v48 = vpack.c.bf16 %v691_v0, %v690_v6  ;;  %v779_v59 = vrot.slane %v4882_v38, 1  ;;  %v1919_v29 = vrot.slane %v4882_v38, 2  ;;  %v383_v6 = vmax.f32 %v341_v32, 0.0 }
  0xbc   : > { %v528_v1 = vpop.permute.xlu1 %527  ;;  %v523_v40 = vpop.permute.xlu0 %522  ;;  %v1918_v50 = vrot.slane %v4888_v49, 1  ;;  %v4901_v24 = vsel %vm1898_vm2, %v4839_v2, %v1952_v30  ;;  %v359_v14 = vadd.f32 %v4476_v41, %v310_v3 }
  0xbd   : > { %6190 = vst [vmem:[#allocation17_spill] sm:$0xff] %v4891_v48  ;;  %6191 = vst [vmem:[#allocation18_spill] sm:$0xff] %v4901_v24  ;;  %v675_v43 = vmul.f32 %v528_v1, %v381_v51  ;;  %v674_v39 = vmul.f32 %v523_v40, %v380_v7  ;;  %v780_v58 = vsel %vm728_vm0, %v775_v25, %v779_v59  ;;  %v4905_v0 = vshll.u32 %v4891_v48, 16 }
  0xbe   : > { %3939 = vmatmul.mubr.msk.bf16.gmra.mxu0 %vm883_vm1, %v780_v58  ;;  %v4910_v36 = vshrl.u32 %v4891_v48, 16  ;;  %v1920_v42 = vor.u32 %v1919_v29, %v1918_v50  ;;  %v847_v24 = vor.u32 %v4863_v15, %v843_v10  ;;  %v382_v40 = vmax.f32 %v340_v56, 0.0 }
  0xbf   : > { %v4912_v62 = vpack.c.bf16 %v675_v43, %v674_v39  ;;  %v851_v51 = vrot.slane %v4905_v0, 1  ;;  %v1955_v7 = vrot.slane %v4905_v0, 2  ;;  %v358_v58 = vadd.f32 %v4476_v41, %v309_v27 }
  0xc0   : > { %v618_v25 = vpop.permute.xlu1 %617  ;;  %v613_v1 = vpop.permute.xlu0 %612  ;;  %v4919_v32 = vsel %vm1898_vm2, %v1916_v46, %v1920_v42  ;;  %v1954_v3 = vrot.slane %v4910_v36, 1  ;;  %v783_v43 = vor.u32 %v4888_v49, %v779_v59  ;;  %v401_v39 = vmax.f32 %v359_v14, 0.0 }
  0xc1   : > { %6192 = vst [vmem:[#allocation19_spill] sm:$0xff] %v4919_v32  ;;  %v693_v2 = vmul.f32 %v618_v25, %v399_v20  ;;  %v692_v29 = vmul.f32 %v613_v1, %v398_v22  ;;  %v852_v50 = vsel %vm728_vm0, %v847_v24, %v851_v51  ;;  %v4924_v10 = vshll.u32 %v4912_v62, 16 }
  0xc2   : > { %3958 = vmatprep.mubr.msk.bf16.mxu1 %vm883_vm1, %v852_v50  ;;  %v4929_v56 = vshrl.u32 %v4912_v62, 16  ;;  %v1956_v41 = vor.u32 %v1955_v7, %v1954_v3  ;;  %v2269_v22 = vrot.slane %v4912_v62, 2  ;;  %v400_v1 = vmax.f32 %v358_v58, 0.0 }
  0xc3   : > { %v4931_v46 = vpack.c.bf16 %v693_v2, %v692_v29  ;;  %v787_v27 = vrot.slane %v4924_v10, 1  ;;  %v1923_v20 = vrot.slane %v4924_v10, 2  ;;  %v855_v29 = vor.u32 %v4910_v36, %v851_v51 }
  0xc4   : > { %v538_v24 = vpop.permute.xlu1 %537  ;;  %v533_v25 = vpop.permute.xlu0 %532  ;;  %v1922_v50 = vrot.slane %v4929_v56, 1  ;;  %v4938_v59 = vsel %vm1898_vm2, %v1952_v30, %v1956_v41  ;;  %v385_v51 = vmax.f32 %v4485_v44, 0.0 }
  0xc5   : > { %6193 = vst [vmem:[#allocation20_spill] sm:$0xff] %v4931_v46  ;;  %6194 = vst [vmem:[#allocation21_spill] sm:$0xff] %v4938_v59  ;;  %v677_v32 = vmul.f32 %v538_v24, %v383_v6  ;;  %v676_v7 = vmul.f32 %v533_v25, %v382_v40  ;;  %v788_v2 = vsel %vm728_vm0, %v783_v43, %v787_v27  ;;  %v4943_v3 = vshll.u32 %v4931_v46, 16 }
  0xc6   : > { %3942 = vmatprep.mubr.msk.bf16.mxu0 %vm883_vm1, %v788_v2  ;;  %v4948_v58 = vshrl.u32 %v4931_v46, 16  ;;  %v1924_v48 = vor.u32 %v1923_v20, %v1922_v50  ;;  %v6195_v40 = vrot.slane %v4866_v23, 2  ;;  %v384_v2 = vmax.f32 %v4488_v45, 0.0 }
  0xc7   : > { %v4950_v30 = vpack.c.bf16 %v677_v32, %v676_v7  ;;  %v859_v14 = vrot.slane %v4943_v3, 1  ;;  %v1959_v6 = vrot.slane %v4943_v3, 2 }
  0xc8   : > { %v4957_v43 = vsel %vm2257_vm3, %v6195_v40, %v2269_v22  ;;  %v628_v24 = vpop.permute.xlu1 %627  ;;  %v623_v25 = vpop.permute.xlu0 %622  ;;  %v4962_v20 = vsel %vm1898_vm2, %v1920_v42, %v1924_v48  ;;  %v1958_v32 = vrot.slane %v4948_v58, 1  ;;  %v791_v40 = vor.u32 %v4929_v56, %v787_v27 }
  0xc9   : > { %6196 = vst [vmem:[#allocation22_spill] sm:$0xff] %v4957_v43  ;;  %6197 = vst [vmem:[#allocation23_spill] sm:$0xff] %v4962_v20  ;;  %v695_v50 = vmul.f32 %v628_v24, %v401_v39  ;;  %v694_v7 = vmul.f32 %v623_v25, %v400_v1  ;;  %v860_v59 = vsel %vm728_vm0, %v855_v29, %v859_v14  ;;  %v4967_v46 = vshll.u32 %v4950_v30, 16 }
  0xca   : > { %3959 = vmatmul.mubr.msk.bf16.gmra.mxu1 %vm883_vm1, %v860_v59  ;;  %v4972_v44 = vshrl.u32 %v4950_v30, 16  ;;  %v1960_v45 = vor.u32 %v1959_v6, %v1958_v32  ;;  %v2271_v1 = vrot.slane %v4950_v30, 2  ;;  %v403_v25 = vmax.f32 %v4501_v52, 0.0 }
  0xcb   : > { %v4974_v43 = vpack.c.bf16 %v695_v50, %v694_v7  ;;  %v795_v42 = vrot.slane %v4967_v46, 1  ;;  %v1927_v39 = vrot.slane %v4967_v46, 2  ;;  %v402_v59 = vmax.f32 %v4504_v53, 0.0 }
  0xcc   : > { %v548_v29 = vpop.permute.xlu1 %547  ;;  %v543_v24 = vpop.permute.xlu0 %542  ;;  %v1926_v27 = vrot.slane %v4972_v44, 1  ;;  %v4983_v20 = vsel %vm1898_vm2, %v1956_v41, %v1960_v45  ;;  %v863_v8 = vor.u32 %v4948_v58, %v859_v14  ;;  %v405_v52 = vmax.f32 %v4517_v60, 0.0 }
  0xcd   : > { %6198 = vst [vmem:[#allocation24_spill] sm:$0xff] %v4974_v43  ;;  %6199 = vst [vmem:[#allocation25_spill] sm:$0xff] %v4983_v20  ;;  %v679_v6 = vmul.f32 %v548_v29, %v385_v51  ;;  %v678_v32 = vmul.f32 %v543_v24, %v384_v2  ;;  %v796_v50 = vsel %vm728_vm0, %v791_v40, %v795_v42  ;;  %v4987_v7 = vshll.u32 %v4974_v43, 16 }
  0xce   : > { %3943 = vmatmul.mubr.msk.bf16.gmra.mxu0 %vm883_vm1, %v796_v50  ;;  %v4993_v53 = vshrl.u32 %v4974_v43, 16  ;;  %v1928_v63 = vor.u32 %v1927_v39, %v1926_v27  ;;  %v5000_v2 = vsel %vm2257_vm3, %v2269_v22, %v2271_v1  ;;  %v404_v24 = vmax.f32 %v4520_v61, 0.0 }
  0xcf   : > { %6200 = vst [vmem:[#allocation26_spill] sm:$0xff] %v4987_v7  ;;  %v4995_v19 = vpack.c.bf16 %v679_v6, %v678_v32  ;;  %v867_v41 = vrot.slane %v4987_v7, 1  ;;  %v1963_v51 = vrot.slane %v4987_v7, 2  ;;  %6202 = vst [vmem:[#allocation28_spill] sm:$0xff] %v5000_v2  ;;  %v1357_v14 = vrot.slane %v4593_v13, 1 }
  0xd0   : > { %v638_v40 = vpop.permute.xlu1 %637  ;;  %v633_v29 = vpop.permute.xlu0 %632  ;;  %v5005_v60 = vsel %vm1898_vm2, %v1924_v48, %v1928_v63  ;;  %v1962_v39 = vrot.slane %v4993_v53, 1  ;;  %v799_v22 = vor.u32 %v4972_v44, %v795_v42  ;;  %v1358_v2 = vrot.slane %v4591_v12, 1 }
  0xd1   : > { %6201 = vst [vmem:[#allocation27_spill] sm:$0xff] %v4995_v19  ;;  %6203 = vst [vmem:[#allocation29_spill] sm:$0xff] %v5005_v60  ;;  %v697_v27 = vmul.f32 %v638_v40, %v403_v25  ;;  %v696_v6 = vmul.f32 %v633_v29, %v402_v59  ;;  %v868_v32 = vsel %vm728_vm0, %v863_v8, %v867_v41  ;;  %v5010_v50 = vshll.u32 %v4995_v19, 16 }
  0xd2   : > { %3962 = vmatprep.mubr.msk.bf16.mxu1 %vm883_vm1, %v868_v32  ;;  %v5015_v61 = vshrl.u32 %v4995_v19, 16  ;;  %v1964_v48 = vor.u32 %v1963_v51, %v1962_v39  ;;  %v407_v32 = vmax.f32 %v4533_v4, 0.0  ;;  %v406_v42 = vmax.f32 %v4536_v5, 0.0 }
  0xd3   : > { %v5018_v20 = vpack.c.bf16 %v697_v27, %v696_v6  ;;  %v803_v25 = vrot.slane %v5010_v50, 1  ;;  %v1931_v59 = vrot.slane %v5010_v50, 2 }
  0xd4   : > { %v648_v40 = vpop.permute.xlu1 %647  ;;  %v643_v29 = vpop.permute.xlu0 %642  ;;  %v1930_v60 = vrot.slane %v5015_v61, 1  ;;  %v5027_v43 = vsel %vm1898_vm2, %v1960_v45, %v1964_v48  ;;  %v6204_v45 = vrot.slane %v4650_v18, 1 }
  0xd5   : > { %v699_v51 = vmul.f32 %v648_v40, %v405_v52  ;;  %v698_v39 = vmul.f32 %v643_v29, %v404_v24  ;;  %v804_v27 = vsel %vm728_vm0, %v799_v22, %v803_v25  ;;  %v807_v6 = vor.u32 %v5015_v61, %v803_v25 }
  0xd6   : > { %3946 = vmatprep.mubr.msk.bf16.mxu0 %vm883_vm1, %v804_v27  ;;  %v5033_v8 = vshll.u32 %v5018_v20, 16  ;;  %v5035_v7 = vor.u32 %v1931_v59, %v1930_v60  ;;  %v1966_v4 = vshrl.u32 %v5018_v20, 16  ;;  %v1359_v24 = vsel %vm1356_vm4, %v1357_v14, %v1358_v2 }
  0xd7   : > { %v5038_v5 = vpack.c.bf16 %v699_v51, %v698_v39  ;;  %v812_v52 = vsel %vm728_vm0, %v807_v6, %v6204_v45  ;;  %v6205_v22 = vrot.slane %v4995_v19, 2  ;;  %v871_v60 = vor.u32 %v4993_v53, %v867_v41 }
  0xd8   : > { %v658_v40 = vpop.permute.xlu1 %657  ;;  %v653_v29 = vpop.permute.xlu0 %652  ;;  %3947 = vmatmul.mubr.msk.bf16.gmra.mxu0 %vm883_vm1, %v812_v52  ;;  %v875_v59 = vrot.slane %v5033_v8, 1  ;;  %v5055_v39 = vsel %vm1898_vm2, %v1928_v63, %v5035_v7  ;;  %v1969_v6 = vrot.slane %v5033_v8, 2  ;;  %v1360_v63 = vrot.slane %v4616_v34, 1 }
  0xd9   : > { %v5047_v25 = vsel %vm2257_vm3, %v2271_v1, %v6205_v22  ;;  %v701_v14 = vmul.f32 %v658_v40, %v407_v32  ;;  %v700_v27 = vmul.f32 %v653_v29, %v406_v42  ;;  %4006 = vmatprep.mubr.msk.bf16.mxu0 %vm883_vm1, %v1359_v24  ;;  %v1968_v1 = vrot.slane %v1966_v4, 1 }
  0xda   : > { %v876_v45 = vsel %vm728_vm0, %v871_v60, %v875_v59  ;;  %v6161_v41 = vshrl.u32 %v5038_v5, 16  ;;  %v6160_v52 = vshll.u32 %v5038_v5, 16  ;;  %v1671_v22 = vrot.slane %v5038_v5, 1 }
  0xdb   : > { %v5065_v51 = vpack.c.bf16 %v701_v14, %v700_v27  ;;  %3963 = vmatmul.mubr.msk.bf16.gmra.mxu1 %vm883_vm1, %v876_v45  ;;  %v1362_v32 = vrot.slane %v4694_v55, 1  ;;  %v1970_v42 = vor.u32 %v1969_v6, %v1968_v1  ;;  %v6206_v29 = vrot.slane %v5018_v20, 1 }
  0xdc   : > { %3968 = vmatprep.mubr.msk.bf16.mxu1 %vm883_vm1, %v4593_v13  ;;  %v1975_v24 = vrot.slane %v6161_v41, 1  ;;  %v1978_v40 = vrot.slane %v6160_v52, 2  ;;  %v2808_v59 = vrot.slane %v4771_v21, 3  ;;  %v2807_v14 = vrot.slane %v4777_v28, 2  ;;  %v5089_v13 = vld [vmem:[%s6126_s4 + $0x30] sm:$0xff]  }
  0xdd   : > { %v5079_v60 = vsel %vm1356_vm4, %v6206_v29, %v1671_v22  ;;  %v5084_v27 = vsel %vm1898_vm2, %v1964_v48, %v1970_v42  ;;  %v6159_v6 = vrot.slane %v5018_v20, 2  ;;  %v2293_v45 = vrot.slane %v5038_v5, 2 }
  0xde   : > { %v1979_v1 = vor.u32 %v1978_v40, %v1975_v24  ;;  %v5094_v22 = vsel %vm1356_vm4, %v1358_v2, %v1360_v63  ;;  %v5097_v21 = vsel %vm1356_vm4, %v1360_v63, %v1362_v32  ;;  %v1364_v28 = vrot.slane %v4749_v57, 1 }
  0xdf   : > { %v2572_v48 = vrot.slane %v5065_v51, 2  ;;  %v5109_v24 = vsel %vm2257_vm3, %v6159_v6, %v2293_v45  ;;  %v2803_v2 = vrot.slane %v4716_v17, 2  ;;  %v2804_v63 = vrot.slane %v4713_v16, 3 }
  0xe0   : > { %4007 = vmatmul.mubr.msk.bf16.vlgmr.msra.gmra.mxu0 %vm883_vm1, %v5094_v22  ;;  %v5104_v29 = vsel %vm1898_vm2, %v1970_v42, %v1979_v1  ;;  %v1366_v40 = vrot.slane %v4814_v54, 1  ;;  %v5120_v42 = vld [vmem:[%s6126_s4 + $0x28] sm:$0xff]   ;;  %v2809_v6 = vor.u32 %v2808_v59, %v2807_v14  ;;  %v2811_v17 = vrot.slane %v4834_v33, 2 }
  0xe1   : > { %4010 = vmatprep.mubr.msk.bf16.mxu0 %vm883_vm1, %v5097_v21  ;;  %4081 = vmatpush3.bf16.msra.mxu0 %v4643_v11  ;;  %v5123_v1 = vsel %vm2257_vm3, %v2293_v45, %v2572_v48  ;;  %v2805_v16 = vor.u32 %v2804_v63, %v2803_v2  ;;  %v2812_v11 = vrot.slane %v4829_v9, 3  ;;  %v5131_v52 = vsel %vm1356_vm4, %v1362_v32, %v1364_v28 }
  0xe2   : > { %4156 = vmatprep.subr.bf16.mxu0 %v5089_v13  ;;  %v6162_v41 = vrot.slane %v4866_v23, 3  ;;  %v3166_v45 = vrot.slane %v4912_v62, 3  ;;  %v2815_v59 = vrot.slane %v4888_v49, 2  ;;  %v2816_v14 = vrot.slane %v4882_v38, 3 }
  0xe3   : > { %3969 = vmatmul.mubr.msk.bf16.vlgmr.msra.gmra.mxu1 %vm883_vm1, %v4591_v12  ;;  %v5141_v9 = vsel %vm2799_vm6, %v4729_v35, %v2805_v16  ;;  %v5144_v33 = vsel %vm2799_vm6, %v2805_v16, %v2809_v6  ;;  %v2813_v32 = vor.u32 %v2812_v11, %v2811_v17  ;;  %v5148_v48 = vsel %vm1356_vm4, %v1364_v28, %v1366_v40 }
  0xe4   : > { %4043 = vmatpush3.bf16.msra.mxu1 %v4763_v26  ;;  %3972 = vmatprep.mubr.msk.bf16.mxu1 %vm883_vm1, %v4616_v34  ;;  %v5154_v26 = vsel %vm3156_vm5, %v6162_v41, %v3166_v45  ;;  %v2819_v49 = vrot.slane %v4929_v56, 2  ;;  %v2820_v35 = vrot.slane %v4924_v10, 3  ;;  %v2817_v63 = vor.u32 %v2816_v14, %v2815_v59 }
  0xe5   : > { %4118 = vmatprep.subr.bf16.mxu1 %v5120_v42  ;;  %v5159_v2 = vsel %vm2799_vm6, %v2809_v6, %v2813_v32  ;;  %v3168_v38 = vrot.slane %v4950_v30, 3  ;;  %v6163_v28 = vrot.slane %v4995_v19, 3  ;;  %v2823_v17 = vrot.slane %v4972_v44, 2 }
  0xe6   : > { %v2821_v16 = vor.u32 %v2820_v35, %v2819_v49  ;;  %v2824_v11 = vrot.slane %v4967_v46, 3  ;;  %v2827_v41 = vrot.slane %v5015_v61, 2  ;;  %v5169_v10 = vsel %vm2799_vm6, %v2813_v32, %v2817_v63 }
  0xe7   : > { %v5172_v56 = vsel %vm3156_vm5, %v3166_v45, %v3168_v38  ;;  %v5177_v6 = vsel %vm3156_vm5, %v3168_v38, %v6163_v28  ;;  %v2828_v44 = vrot.slane %v5010_v50, 3  ;;  %v1368_v45 = vrot.slane %v4866_v23, 1 }
  0xe8   : > { %4011 = vmatmul.mubr.msk.bf16.gmra.mxu0 %vm883_vm1, %v5131_v52  ;;  %v5183_v46 = vsel %vm2799_vm6, %v2817_v63, %v2821_v16  ;;  %v2825_v61 = vor.u32 %v2824_v11, %v2823_v17  ;;  %v1370_v32 = vrot.slane %v4912_v62, 1  ;;  %v2844_v49 = vrot.slane %v4803_v37, 3 }
  0xe9   : > { %4014 = vmatprep.mubr.msk.bf16.mxu0 %vm883_vm1, %v5148_v48  ;;  %v5185_v59 = vor.u32 %v2828_v44, %v2827_v41  ;;  %v2843_v41 = vrot.slane %v4808_v31, 2  ;;  %v2872_v35 = vshrl.u32 %v5065_v51, 16  ;;  %v5204_v63 = vsel %vm1356_vm4, %v1366_v40, %v1368_v45 }
  0xea   : > { %v5192_v14 = vsel %vm2799_vm6, %v2821_v16, %v2825_v61  ;;  %v5207_v38 = vsel %vm1356_vm4, %v1368_v45, %v1370_v32  ;;  %v2847_v16 = vrot.slane %v4863_v15, 2  ;;  %v2875_v17 = vshll.u32 %v5065_v51, 16 }
  0xeb   : > { %6207 = vst [vmem:[#allocation30_spill] sm:$0xff] %v5185_v59  ;;  %3973 = vmatmul.mubr.msk.bf16.gmra.mxu1 %vm883_vm1, %v4694_v55  ;;  %v5198_v50 = vsel %vm2799_vm6, %v2825_v61, %v5185_v59  ;;  %v5213_v11 = vor.u32 %v2844_v49, %v2843_v41  ;;  %v2848_v31 = vrot.slane %v4857_v47, 3  ;;  %v2851_v37 = vrot.slane %v4910_v36, 2 }
  0xec   : > { %3976 = vmatprep.mubr.msk.bf16.mxu1 %vm883_vm1, %v4749_v57  ;;  %v2852_v40 = vrot.slane %v4905_v0, 3  ;;  %v1372_v44 = vrot.slane %v4950_v30, 1  ;;  %v1374_v15 = vrot.slane %v4995_v19, 1  ;;  %v2855_v45 = vrot.slane %v4948_v58, 2 }
  0xed   : > { %6208 = vst [vmem:[#allocation31_spill] sm:$0xff] %v5213_v11  ;;  %v2849_v61 = vor.u32 %v2848_v31, %v2847_v16  ;;  %v2874_v28 = vrot.slane %v2872_v35, 2  ;;  %v2856_v47 = vrot.slane %v4943_v3, 3  ;;  %v2859_v36 = vrot.slane %v4993_v53, 2  ;;  %v6210_v16 = vld [vmem:[#allocation26_spill] sm:$0xff] }
  0xee   : > { %v2853_v41 = vor.u32 %v2852_v40, %v2851_v37  ;;  %v2877_v49 = vrot.slane %v2875_v17, 3  ;;  %v2860_v31 = vrot.slane %v6210_v16, 3  ;;  %v3190_v3 = vrot.slane %v5038_v5, 3 }
  0xef   : > { %v5231_v0 = vsel %vm2799_vm6, %v5213_v11, %v2849_v61  ;;  %v2857_v37 = vor.u32 %v2856_v47, %v2855_v45  ;;  %v2863_v53 = vrot.slane %v1966_v4, 2  ;;  %v5242_v17 = vsel %vm1356_vm4, %v1370_v32, %v1372_v44 }
  0xf0   : > { %4015 = vmatmul.mubr.msk.bf16.gmra.mxu0 %vm883_vm1, %v5204_v63  ;;  %6209 = vst [vmem:[#allocation32_spill] sm:$0xff] %v5231_v0  ;;  %v5236_v35 = vsel %vm2799_vm6, %v2849_v61, %v2853_v41  ;;  %v2861_v40 = vor.u32 %v2860_v31, %v2859_v36  ;;  %v2864_v11 = vrot.slane %v5033_v8, 3  ;;  %v6212_v0 = vshrl.u32 %v5038_v5, 16 }
  0xf1   : > { %4018 = vmatprep.mubr.msk.bf16.mxu0 %vm883_vm1, %v5207_v38  ;;  %6211 = vst [vmem:[#allocation26_spill] sm:$0xff] %v5236_v35  ;;  %v5248_v58 = vsel %vm2799_vm6, %v2853_v41, %v2857_v37  ;;  %v6214_v61 = vrot.slane %v5018_v20, 3  ;;  %v6216_v47 = vshll.u32 %v5038_v5, 16  ;;  %v3192_v32 = vrot.slane %v5065_v51, 3 }
  0xf2   : > { %v2867_v16 = vrot.slane %v6212_v0, 2  ;;  %6213 = vst [vmem:[#allocation33_spill] sm:$0xff] %v5248_v58  ;;  %v5261_v8 = vsel %vm1356_vm4, %v1372_v44, %v1374_v15  ;;  %v5264_v36 = vsel %vm2799_vm6, %v2857_v37, %v2861_v40  ;;  %v2865_v41 = vor.u32 %v2864_v11, %v2863_v53  ;;  %v6242_v58 = vld [vmem:[#allocation9_spill] sm:$0xff] }
  0xf3   : > { %3977 = vmatmul.mubr.msk.bf16.gmra.mxu1 %vm883_vm1, %v4814_v54  ;;  %v5253_v45 = vsel %vm3156_vm5, %v6214_v61, %v3190_v3  ;;  %v2868_v4 = vrot.slane %v6216_v47, 3  ;;  %6217 = vst [vmem:[#allocation35_spill] sm:$0xff] %v5264_v36  ;;  %v2878_v0 = vor.u32 %v2877_v49, %v2874_v28  ;;  %v5269_v5 = vsel %vm3156_vm5, %v3190_v3, %v3192_v32  ;;  %v6222_v28 = vld [vmem:[#allocation3_spill] sm:$0xff]  ;;  %v6223_v49 = vld [vmem:[#allocation2_spill] sm:$0xff] }
  0xf4   : > { %3980 = vmatprep.mubr.msk.bf16.mxu1 %vm883_vm1, %v4866_v23  ;;  %6215 = vst [vmem:[#allocation34_spill] sm:$0xff] %v5253_v45  ;;  %6218 = vst [vmem:[#allocation36_spill] sm:$0xff] %v5269_v5  ;;  %v5272_v51 = vsel %vm2799_vm6, %v2861_v40, %v2865_v41  ;;  %v1378_v11 = vrot.slane %v6222_v28, 1  ;;  %v1376_v3 = vrot.slane %v6223_v49, 1  ;;  %v6231_v45 = vld [vmem:[#allocation4_spill] sm:$0xff]  ;;  %v1943_v35 = vrot.slane %v6242_v58, 2 }
  0xf5   : > { %v2869_v31 = vor.u32 %v2868_v4, %v2867_v16  ;;  %6219 = vst [vmem:[#allocation37_spill] sm:$0xff] %v5272_v51  ;;  %v6225_v16 = vld [vmem:[#allocation11_spill] sm:$0xff] }
  0xf6   : > { %v5287_v53 = vsel %vm1356_vm4, %v1374_v15, %v1376_v3  ;;  %v1382_v15 = vrot.slane %v6225_v16, 1  ;;  %v6226_v4 = vld [vmem:[#allocation15_spill] sm:$0xff] }
  0xf7   : > { %v5277_v44 = vsel %vm2799_vm6, %v2865_v41, %v2869_v31  ;;  %v5280_v37 = vsel %vm2799_vm6, %v2869_v31, %v2878_v0  ;;  %v1384_v32 = vrot.slane %v6226_v4, 1  ;;  %v6227_v41 = vld [vmem:[#allocation17_spill] sm:$0xff] }
  0xf8   : > { %4019 = vmatmul.mubr.msk.bf16.gmra.mxu0 %vm883_vm1, %v5242_v17  ;;  %6220 = vst [vmem:[#allocation38_spill] sm:$0xff] %v5277_v44  ;;  %6221 = vst [vmem:[#allocation39_spill] sm:$0xff] %v5280_v37  ;;  %v1386_v0 = vrot.slane %v6227_v41, 1  ;;  %v6229_v37 = vld [vmem:[#allocation24_spill] sm:$0xff] }
  0xf9   : > { %4022 = vmatprep.mubr.msk.bf16.mxu0 %vm883_vm1, %v5261_v8  ;;  %v1385_v31 = vsel %vm1356_vm4, %v1382_v15, %v1384_v32  ;;  %v1390_v5 = vrot.slane %v6229_v37, 1 }
  0xfb   : > { %3981 = vmatmul.mubr.msk.bf16.gmra.mxu1 %vm883_vm1, %v4912_v62  ;;  %v5292_v62 = vsel %vm1356_vm4, %v1376_v3, %v1378_v11  ;;  %v6228_v3 = vld [vmem:[#allocation20_spill] sm:$0xff] }
  0xfc   : > { %3984 = vmatprep.mubr.msk.bf16.mxu1 %vm883_vm1, %v4950_v30  ;;  %v6224_v30 = vld [vmem:[#allocation7_spill] sm:$0xff] }
  0xfd   : > { %v1380_v40 = vrot.slane %v6224_v30, 1 }
  0xff   : > { %v5303_v61 = vsel %vm1356_vm4, %v1378_v11, %v1380_v40  ;;  %v5308_v47 = vsel %vm1356_vm4, %v1380_v40, %v1382_v15  ;;  %v1387_v11 = vsel %vm1356_vm4, %v1384_v32, %v1386_v0  ;;  %v1388_v40 = vrot.slane %v6228_v3, 1 }
 0x100   : > { %4023 = vmatmul.mubr.msk.bf16.gmra.mxu0 %vm883_vm1, %v5287_v53  ;;  %v6230_v32 = vrot.slane %v5018_v20, 1 }
 0x101   : > { %4026 = vmatprep.mubr.msk.bf16.mxu0 %vm883_vm1, %v5292_v62  ;;  %v1389_v44 = vsel %vm1356_vm4, %v1386_v0, %v1388_v40  ;;  %v1391_v15 = vsel %vm1356_vm4, %v1388_v40, %v1390_v5  ;;  %v5349_v0 = vld [vmem:[%s6126_s4 + $0x40] sm:$0xff]  }
 0x102   : > { %v1393_v51 = vsel %vm1356_vm4, %v1390_v5, %v6230_v32  ;;  %v6232_v40 = vld [vmem:[#allocation10_spill] sm:$0xff]  ;;  %v6233_v5 = vld [vmem:[#allocation13_spill] sm:$0xff] }
 0x103   : > { %3985 = vmatmul.mubr.msk.bf16.gmra.mxu1 %vm883_vm1, %v4995_v19 }
 0x104   : > { %3988 = vmatprep.mubr.msk.bf16.mxu1 %vm883_vm1, %v6223_v49 }
 0x108   : > { %4027 = vmatmul.mubr.msk.bf16.gmra.mxu0 %vm883_vm1, %v5303_v61 }
 0x109   : > { %4030 = vmatprep.mubr.msk.bf16.mxu0 %vm883_vm1, %v5308_v47 }
 0x10b   : > { %3989 = vmatmul.mubr.msk.bf16.gmra.mxu1 %vm883_vm1, %v6222_v28 }
 0x10c   : > { %3992 = vmatprep.mubr.msk.bf16.mxu1 %vm883_vm1, %v6224_v30 }
 0x110   : > { %4031 = vmatmul.mubr.msk.bf16.gmra.mxu0 %vm883_vm1, %v1385_v31 }
 0x111   : > { %4034 = vmatprep.mubr.msk.bf16.mxu0 %vm883_vm1, %v1387_v11 }
 0x113   : > { %3993 = vmatmul.mubr.msk.bf16.gmra.mxu1 %vm883_vm1, %v6225_v16 }
 0x114   : > { %3996 = vmatprep.mubr.msk.bf16.mxu1 %vm883_vm1, %v6226_v4 }
 0x118   : > { %4035 = vmatmul.mubr.msk.bf16.gmra.mxu0 %vm883_vm1, %v1389_v44 }
 0x119   : > { %4038 = vmatprep.mubr.msk.bf16.mxu0 %vm883_vm1, %v1391_v15 }
 0x11b   : > { %3997 = vmatmul.mubr.msk.bf16.gmra.mxu1 %vm883_vm1, %v6227_v41 }
 0x11c   : > { %4000 = vmatprep.mubr.msk.bf16.mxu1 %vm883_vm1, %v6228_v3 }
 0x120   : > { %4039 = vmatmul.mubr.msk.bf16.gmra.mxu0 %vm883_vm1, %v1393_v51 }
 0x121   : > { %4082 = vmatprep.mubr.msk.bf16.mxu0 %vm883_vm1, %v6231_v45  ;;  %v5359_v45 = vld [vmem:[%s6126_s4 + $0x38] sm:$0xff]  }
 0x123   : > { %4001 = vmatmul.mubr.msk.bf16.gmra.mxu1 %vm883_vm1, %v6229_v37 }
 0x124   : > { %4044 = vmatprep.mubr.msk.bf16.mxu1 %vm883_vm1, %v5094_v22  ;;  %v6234_v22 = vld [vmem:[#allocation16_spill] sm:$0xff] }
 0x128   : > { %4083 = vmatmul.mubr.msk.bf16.vlgmr.msra.gmra.mxu0 %vm883_vm1, %v6232_v40  ;;  %v1935_v40 = vrot.slane %v4650_v18, 2 }
 0x129   : > { %4086 = vmatprep.mubr.msk.bf16.mxu0 %vm883_vm1, %v6233_v5  ;;  %4157 = vmatpush3.bf16.msra.mxu0 %v5089_v13  ;;  %v6235_v13 = vld [vmem:[#allocation19_spill] sm:$0xff]  ;;  %v6239_v5 = vld [vmem:[#allocation8_spill] sm:$0xff] }
 0x12a   : > { %4232 = vmatprep.subr.bf16.mxu0 %v5349_v0 }
 0x12b   : > { %4045 = vmatmul.mubr.msk.bf16.vlgmr.msra.gmra.mxu1 %vm883_vm1, %v5097_v21  ;;  %v6236_v21 = vld [vmem:[#allocation23_spill] sm:$0xff] }
 0x12c   : > { %4119 = vmatpush3.bf16.msra.mxu1 %v5120_v42  ;;  %4048 = vmatprep.mubr.msk.bf16.mxu1 %vm883_vm1, %v5131_v52  ;;  %v6237_v42 = vld [vmem:[#allocation29_spill] sm:$0xff] }
 0x12d   : > { %4194 = vmatprep.subr.bf16.mxu1 %v5359_v45  ;;  %v6238_v52 = vld [vmem:[#allocation5_spill] sm:$0xff] }
 0x12e   : > { %v1934_v32 = vrot.slane %v6238_v52, 1 }
 0x130   : > { %4087 = vmatmul.mubr.msk.bf16.gmra.mxu0 %vm883_vm1, %v6234_v22  ;;  %v1938_v22 = vrot.slane %v6239_v5, 1 }
 0x131   : > { %4090 = vmatprep.mubr.msk.bf16.mxu0 %vm883_vm1, %v6235_v13 }
 0x133   : > { %4049 = vmatmul.mubr.msk.bf16.gmra.mxu1 %vm883_vm1, %v5148_v48  ;;  %v1936_v48 = vor.u32 %v1935_v40, %v1934_v32 }
 0x134   : > { %4052 = vmatprep.mubr.msk.bf16.mxu1 %vm883_vm1, %v5204_v63  ;;  %v6240_v63 = vld [vmem:[#allocation6_spill] sm:$0xff] }
 0x135   : > { %v1939_v13 = vrot.slane %v6240_v63, 2 }
 0x138   : > { %4091 = vmatmul.mubr.msk.bf16.gmra.mxu0 %vm883_vm1, %v6236_v21  ;;  %v1937_v21 = vsel %vm1898_vm2, %v5035_v7, %v1936_v48 }
 0x139   : > { %4094 = vmatprep.mubr.msk.bf16.mxu0 %vm883_vm1, %v6237_v42  ;;  %v6241_v42 = vld [vmem:[#allocation12_spill] sm:$0xff] }
 0x13a   : > { %v1942_v36 = vrot.slane %v6241_v42, 1 }
 0x13b   : > { %4053 = vmatmul.mubr.msk.bf16.gmra.mxu1 %vm883_vm1, %v5207_v38  ;;  %v1940_v38 = vor.u32 %v1939_v13, %v1938_v22 }
 0x13c   : > { %4056 = vmatprep.mubr.msk.bf16.mxu1 %vm883_vm1, %v5242_v17  ;;  %v1944_v17 = vor.u32 %v1943_v35, %v1942_v36  ;;  %v6244_v35 = vld [vmem:[#allocation18_spill] sm:$0xff]  ;;  %v6245_v36 = vld [vmem:[#allocation21_spill] sm:$0xff] }
 0x13d   : > { %v1941_v32 = vsel %vm1898_vm2, %v1936_v48, %v1940_v38 }
 0x13e   : > { %v1945_v7 = vsel %vm1898_vm2, %v1940_v38, %v1944_v17 }
 0x140   : > { %4095 = vmatmul.mubr.msk.bf16.gmra.mxu0 %vm883_vm1, %v5055_v39  ;;  %v6243_v39 = vld [vmem:[#allocation14_spill] sm:$0xff] }
 0x141   : > { %4098 = vmatprep.mubr.msk.bf16.mxu0 %vm883_vm1, %v1937_v21  ;;  %v6247_v21 = vrot.slane %v4866_v23, 2 }
 0x143   : > { %4057 = vmatmul.mubr.msk.bf16.gmra.mxu1 %vm883_vm1, %v5261_v8  ;;  %v1949_v8 = vsel %vm1898_vm2, %v1944_v17, %v6243_v39 }
 0x144   : > { %4060 = vmatprep.mubr.msk.bf16.mxu1 %vm883_vm1, %v5287_v53  ;;  %v6246_v53 = vld [vmem:[#allocation25_spill] sm:$0xff] }
 0x148   : > { %4099 = vmatmul.mubr.msk.bf16.gmra.mxu0 %vm883_vm1, %v1941_v32 }
 0x149   : > { %4102 = vmatprep.mubr.msk.bf16.mxu0 %vm883_vm1, %v1945_v7 }
 0x14b   : > { %4061 = vmatmul.mubr.msk.bf16.gmra.mxu1 %vm883_vm1, %v5292_v62 }
 0x14c   : > { %4064 = vmatprep.mubr.msk.bf16.mxu1 %vm883_vm1, %v5303_v61  ;;  %v2261_v61 = vrot.slane %v4694_v55, 2 }
 0x150   : > { %4103 = vmatmul.mubr.msk.bf16.gmra.mxu0 %vm883_vm1, %v1949_v8 }
 0x151   : > { %4106 = vmatprep.mubr.msk.bf16.mxu0 %vm883_vm1, %v6244_v35  ;;  %v6252_v35 = vld [vmem:[#allocation28_spill] sm:$0xff] }
 0x153   : > { %4065 = vmatmul.mubr.msk.bf16.gmra.mxu1 %vm883_vm1, %v5308_v47  ;;  %v2259_v47 = vrot.slane %v4616_v34, 2 }
 0x154   : > { %4068 = vmatprep.mubr.msk.bf16.mxu1 %vm883_vm1, %v1385_v31 }
 0x158   : > { %4107 = vmatmul.mubr.msk.bf16.gmra.mxu0 %vm883_vm1, %v6245_v36 }
 0x159   : > { %4110 = vmatprep.mubr.msk.bf16.mxu0 %vm883_vm1, %v6246_v53 }
 0x15a   : > { %v5426_v62 = vpop.f32.mrf.mxu0 }
 0x15b   : > { %4069 = vmatmul.mubr.msk.bf16.gmra.mxu1 %vm883_vm1, %v1387_v11 }
 0x15c   : > { %4072 = vmatprep.mubr.msk.bf16.mxu1 %vm883_vm1, %v1389_v44  ;;  %v5431_v31 = vpop.f32.mrf.mxu0  ;;  %v2263_v44 = vrot.slane %v4749_v57, 2 }
 0x15e   : > { %v5442_v11 = vpop.f32.mrf.mxu0 }
 0x160   : > { %4111 = vmatmul.mubr.msk.bf16.gmra.mxu0 %vm883_vm1, %v5027_v43  ;;  %v2262_v43 = vsel %vm2257_vm3, %v2259_v47, %v2261_v61  ;;  %v5447_v40 = vpop.f32.mrf.mxu0 }
 0x161   : > { %4114 = vmatprep.mubr.msk.bf16.mxu0 %vm883_vm1, %v5084_v27  ;;  %v2258_v27 = vrot.slane %v4591_v12, 2 }
 0x163   : > { %4073 = vmatmul.mubr.msk.bf16.gmra.mxu1 %vm883_vm1, %v1391_v15  ;;  %v2265_v15 = vrot.slane %v4814_v54, 2 }
 0x164   : > { %4076 = vmatprep.mubr.msk.bf16.mxu1 %vm883_vm1, %v1393_v51  ;;  %v2260_v51 = vsel %vm2257_vm3, %v2258_v27, %v2259_v47  ;;  %v2275_v47 = vrot.slane %v6223_v49, 2  ;;  %v6255_v27 = vrot.slane %v4995_v19, 2 }
 0x165   : > { %v2266_v12 = vsel %vm2257_vm3, %v2263_v44, %v2265_v15  ;;  %v2268_v38 = vsel %vm2257_vm3, %v2265_v15, %v6247_v21 }
 0x168   : > { %4115 = vmatmul.mubr.msk.bf16.gmra.mxu0 %vm883_vm1, %v5104_v29  ;;  %v2264_v29 = vsel %vm2257_vm3, %v2261_v61, %v2263_v44  ;;  %v2277_v61 = vrot.slane %v6222_v28, 2 }
 0x169   : > { %4158 = vmatprep.mubr.msk.bf16.mxu0 %vm883_vm1, %v2262_v43 }
 0x16a   : > { %v5451_v48 = vpop.f32.mrf.mxu1  ;;  %v2278_v15 = vsel %vm2257_vm3, %v2275_v47, %v2277_v61 }
 0x16b   : > { %4077 = vmatmul.mubr.msk.bf16.gmra.mxu1 %vm883_vm1, %v5079_v60 }
 0x16c   : > { %4120 = vmatprep.mubr.msk.bf16.mxu1 %vm883_vm1, %v2260_v51  ;;  %v5460_v22 = vpop.f32.mrf.mxu1  ;;  %v2276_v51 = vsel %vm2257_vm3, %v6255_v27, %v2275_v47 }
 0x16e   : > { %v5455_v60 = vpop.f32.mrf.mxu0  ;;  %v5468_v17 = vpop.f32.mrf.mxu1 }
 0x16f   : > { %6248 = vst [vmem:[#allocation3_spill] sm:$0xff] %v5468_v17 }
 0x170   : > { %4159 = vmatmul.mubr.msk.bf16.vlgmr.msra.gmra.mxu0 %vm883_vm1, %v2264_v29  ;;  %v5462_v13 = vpop.f32.mrf.mxu0 }
 0x171   : > { %4162 = vmatprep.mubr.msk.bf16.mxu0 %vm883_vm1, %v2266_v12  ;;  %4233 = vmatpush3.bf16.msra.mxu0 %v5349_v0  ;;  %v6249_v0 = vld [vmem:[#allocation22_spill] sm:$0xff] }
 0x172   : > { %v5472_v32 = vpop.f32.mrf.mxu0 }
 0x173   : > { %4121 = vmatmul.mubr.msk.bf16.vlgmr.msra.gmra.mxu1 %vm883_vm1, %v2262_v43 }
 0x174   : > { %4195 = vmatpush3.bf16.msra.mxu1 %v5359_v45  ;;  %4124 = vmatprep.mubr.msk.bf16.mxu1 %vm883_vm1, %v2264_v29  ;;  %v5476_v45 = vpop.f32.mrf.mxu1  ;;  %v5478_v7 = vpop.f32.mrf.mxu0 }
 0x175   : > { %6250 = vst [vmem:[#allocation2_spill] sm:$0xff] %v5476_v45 }
 0x178   : > { %4163 = vmatmul.mubr.msk.bf16.gmra.mxu0 %vm883_vm1, %v2268_v38 }
 0x179   : > { %4166 = vmatprep.mubr.msk.bf16.mxu0 %vm883_vm1, %v6249_v0 }
 0x17a   : > { %v5480_v39 = vpop.f32.mrf.mxu1 }
 0x17b   : > { %4125 = vmatmul.mubr.msk.bf16.gmra.mxu1 %vm883_vm1, %v2266_v12  ;;  %6251 = vst [vmem:[#allocation4_spill] sm:$0xff] %v5480_v39  ;;  %v2279_v12 = vrot.slane %v6224_v30, 2 }
 0x17c   : > { %4128 = vmatprep.mubr.msk.bf16.mxu1 %vm883_vm1, %v2268_v38  ;;  %v5488_v36 = vpop.f32.mrf.mxu1  ;;  %v2281_v38 = vrot.slane %v6225_v16, 2 }
 0x17d   : > { %6253 = vst [vmem:[#allocation10_spill] sm:$0xff] %v5488_v36  ;;  %v2280_v47 = vsel %vm2257_vm3, %v2277_v61, %v2279_v12  ;;  %v2285_v61 = vrot.slane %v6227_v41, 2  ;;  %v2289_v41 = vrot.slane %v6229_v37, 2 }
 0x17e   : > { %v5482_v8 = vpop.f32.mrf.mxu0  ;;  %v5498_v43 = vpop.f32.mrf.mxu1 }
 0x17f   : > { %6254 = vst [vmem:[#allocation13_spill] sm:$0xff] %v5498_v43 }
 0x180   : > { %4167 = vmatmul.mubr.msk.bf16.gmra.mxu0 %vm883_vm1, %v6252_v35  ;;  %v5492_v53 = vpop.f32.mrf.mxu0  ;;  %v5508_v29 = vpop.f32.mrf.mxu1 }
 0x181   : > { %4170 = vmatprep.mubr.msk.bf16.mxu0 %vm883_vm1, %v5047_v25  ;;  %6256 = vst [vmem:[#allocation16_spill] sm:$0xff] %v5508_v29 }
 0x182   : > { %v5503_v44 = vpop.f32.mrf.mxu0 }
 0x183   : > { %4129 = vmatmul.mubr.msk.bf16.gmra.mxu1 %vm883_vm1, %v6249_v0 }
 0x184   : > { %4132 = vmatprep.mubr.msk.bf16.mxu1 %vm883_vm1, %v6252_v35  ;;  %v5513_v21 = vpop.f32.mrf.mxu0 }
 0x188   : > { %4171 = vmatmul.mubr.msk.bf16.gmra.mxu0 %vm883_vm1, %v2276_v51 }
 0x189   : > { %4174 = vmatprep.mubr.msk.bf16.mxu0 %vm883_vm1, %v2278_v15 }
 0x18a   : > { %v5517_v0 = vpop.f32.mrf.mxu1 }
 0x18b   : > { %4133 = vmatmul.mubr.msk.bf16.gmra.mxu1 %vm883_vm1, %v5047_v25  ;;  %6257 = vst [vmem:[#allocation19_spill] sm:$0xff] %v5517_v0  ;;  %v2282_v25 = vsel %vm2257_vm3, %v2279_v12, %v2281_v38 }
 0x18c   : > { %4136 = vmatprep.mubr.msk.bf16.mxu1 %vm883_vm1, %v2276_v51  ;;  %v5526_v29 = vpop.f32.mrf.mxu1  ;;  %v2283_v51 = vrot.slane %v6226_v4, 2 }
 0x18d   : > { %6258 = vst [vmem:[#allocation23_spill] sm:$0xff] %v5526_v29 }
 0x18e   : > { %v5519_v35 = vpop.f32.mrf.mxu0  ;;  %v5535_v0 = vpop.f32.mrf.mxu1  ;;  %v2284_v12 = vsel %vm2257_vm3, %v2281_v38, %v2283_v51  ;;  %v2286_v29 = vsel %vm2257_vm3, %v2283_v51, %v2285_v61 }
 0x18f   : > { %6259 = vst [vmem:[#allocation29_spill] sm:$0xff] %v5535_v0  ;;  %v2287_v0 = vrot.slane %v6228_v3, 2 }
 0x190   : > { %v5522_v27 = vpop.f32.mrf.mxu0  ;;  %4175 = vmatmul.mubr.msk.bf16.gmra.mxu0 %vm883_vm1, %v2280_v47  ;;  %v5544_v39 = vpop.f32.mrf.mxu1 }
 0x191   : > { %4178 = vmatprep.mubr.msk.bf16.mxu0 %vm883_vm1, %v2282_v25  ;;  %6260 = vst [vmem:[#allocation5_spill] sm:$0xff] %v5544_v39  ;;  %v2288_v30 = vsel %vm2257_vm3, %v2285_v61, %v2287_v0 }
 0x192   : > { %v5529_v43 = vpop.f32.mrf.mxu0 }
 0x193   : > { %4137 = vmatmul.mubr.msk.bf16.gmra.mxu1 %vm883_vm1, %v2278_v15 }
 0x194   : > { %4140 = vmatprep.mubr.msk.bf16.mxu1 %vm883_vm1, %v2280_v47  ;;  %v5537_v36 = vpop.f32.mrf.mxu0 }
 0x198   : > { %v5540_v16 = vpop.f32.mrf.mxu0  ;;  %4179 = vmatmul.mubr.msk.bf16.gmra.mxu0 %vm883_vm1, %v2284_v12 }
 0x199   : > { %4182 = vmatprep.mubr.msk.bf16.mxu0 %vm883_vm1, %v2286_v29 }
 0x19a   : > { %v5547_v15 = vpop.f32.mrf.mxu0 }
 0x19b   : > { %v5549_v47 = vpop.f32.mrf.mxu1  ;;  %4141 = vmatmul.mubr.msk.bf16.gmra.mxu1 %vm883_vm1, %v2282_v25  ;;  %v2290_v25 = vsel %vm2257_vm3, %v2287_v0, %v2289_v41 }
 0x19c   : > { %6261 = vst [vmem:[#allocation8_spill] sm:$0xff] %v5549_v47  ;;  %4144 = vmatprep.mubr.msk.bf16.mxu1 %vm883_vm1, %v2284_v12  ;;  %v5554_v38 = vpop.f32.mrf.mxu0 }
 0x19d   : > { %v5557_v4 = vpop.f32.mrf.mxu1 }
 0x19e   : > { %6262 = vst [vmem:[#allocation6_spill] sm:$0xff] %v5557_v4  ;;  %v5559_v51 = vpop.f32.mrf.mxu0 }
 0x19f   : > { %v5561_v39 = vpop.f32.mrf.mxu1 }
 0x1a0   : > { %6263 = vst [vmem:[#allocation14_spill] sm:$0xff] %v5561_v39  ;;  %v4008_v58 = vpop.f32.mrf.mxu0  ;;  %4183 = vmatmul.mubr.msk.bf16.gmra.mxu0 %vm883_vm1, %v2288_v30 }
 0x1a1   : > { %v5566_v47 = vpop.f32.mrf.mxu1  ;;  %4186 = vmatprep.mubr.msk.bf16.mxu0 %vm883_vm1, %v2290_v25 }
 0x1a2   : > { %6264 = vst [vmem:[#allocation18_spill] sm:$0xff] %v5566_v47  ;;  %v1488_v12 = vpop.f32.mrf.mxu0  ;;  %v6265_v47 = vrot.slane %v5018_v20, 2 }
 0x1a3   : > { %v3970_v3 = vpop.f32.mrf.mxu1  ;;  %4145 = vmatmul.mubr.msk.bf16.gmra.mxu1 %vm883_vm1, %v2286_v29 }
 0x1a4   : > { %v1200_v4 = vadd.f32 %v3970_v3, %v5426_v62  ;;  %4148 = vmatprep.mubr.msk.bf16.mxu1 %vm883_vm1, %v2288_v30  ;;  %v4009_v39 = vpop.f32.mrf.mxu0  ;;  %v2292_v42 = vsel %vm2257_vm3, %v2289_v41, %v6265_v47 }
 0x1a5   : > { %v1191_v37 = vpop.f32.mrf.mxu1 }
 0x1a6   : > { %v1192_v61 = vadd.f32 %v1191_v37, %v5431_v31  ;;  %v1491_v59 = vpop.f32.mrf.mxu0  ;;  %v5573_v45 = vadd.f32 %v4008_v58, %v1200_v4 }
 0x1a7   : > { %v3971_v0 = vpop.f32.mrf.mxu1 }
 0x1a8   : > { %v1203_v17 = vadd.f32 %v3971_v0, %v5442_v11  ;;  %v4012_v19 = vpop.f32.mrf.mxu0  ;;  %4187 = vmatmul.mubr.msk.bf16.gmra.mxu0 %vm883_vm1, %v2292_v42  ;;  %v5580_v3 = vadd.f32 %v1488_v12, %v1192_v61  ;;  %v3158_v11 = vrot.slane %v4694_v55, 3 }
 0x1a9   : > { %v1194_v30 = vpop.f32.mrf.mxu1  ;;  %4190 = vmatprep.mubr.msk.bf16.mxu0 %vm883_vm1, %v5109_v24 }
 0x1aa   : > { %v1195_v37 = vadd.f32 %v1194_v30, %v5447_v40  ;;  %v1504_v58 = vpop.f32.mrf.mxu0  ;;  %v5585_v4 = vadd.f32 %v4009_v39, %v1203_v17  ;;  %v3157_v40 = vrot.slane %v4616_v34, 3 }
 0x1ab   : > { %v3974_v62 = vpop.f32.mrf.mxu1  ;;  %4149 = vmatmul.mubr.msk.bf16.gmra.mxu1 %vm883_vm1, %v2290_v25 }
 0x1ac   : > { %v1216_v41 = vadd.f32 %v3974_v62, %v5455_v60  ;;  %4152 = vmatprep.mubr.msk.bf16.mxu1 %vm883_vm1, %v2292_v42  ;;  %v4013_v31 = vpop.f32.mrf.mxu0  ;;  %v5591_v29 = vadd.f32 %v1491_v59, %v1195_v37  ;;  %v3159_v42 = vsel %vm3156_vm5, %v3157_v40, %v3158_v11  ;;  %v3162_v37 = vrot.slane %v4814_v54, 3 }
 0x1ad   : > { %v1207_v47 = vpop.f32.mrf.mxu1 }
 0x1ae   : > { %v1208_v12 = vadd.f32 %v1207_v47, %v5462_v13  ;;  %v1507_v61 = vpop.f32.mrf.mxu0  ;;  %v5595_v17 = vadd.f32 %v4012_v19, %v1216_v41 }
 0x1af   : > { %v3975_v39 = vpop.f32.mrf.mxu1 }
 0x1b0   : > { %v1219_v25 = vadd.f32 %v3975_v39, %v5472_v32  ;;  %v4016_v0 = vpop.f32.mrf.mxu0  ;;  %4191 = vmatmul.mubr.msk.bf16.gmra.mxu0 %vm883_vm1, %v5123_v1  ;;  %v5601_v55 = vadd.f32 %v1504_v58, %v1208_v12  ;;  %v3160_v32 = vrot.slane %v4749_v57, 3 }
 0x1b1   : > { %v1210_v59 = vpop.f32.mrf.mxu1  ;;  %4234 = vmatprep.mubr.msk.bf16.mxu0 %vm883_vm1, %v3159_v42 }
 0x1b2   : > { %v1211_v60 = vadd.f32 %v1210_v59, %v5478_v7  ;;  %v1520_v13 = vpop.f32.mrf.mxu0  ;;  %v5605_v34 = vadd.f32 %v4013_v31, %v1219_v25 }
 0x1b3   : > { %v3978_v19 = vpop.f32.mrf.mxu1  ;;  %4153 = vmatmul.mubr.msk.bf16.gmra.mxu1 %vm883_vm1, %v5109_v24  ;;  %v3161_v24 = vsel %vm3156_vm5, %v3158_v11, %v3160_v32 }
 0x1b4   : > { %v1232_v1 = vadd.f32 %v3978_v19, %v5482_v8  ;;  %4196 = vmatprep.mubr.msk.bf16.mxu1 %vm883_vm1, %v5141_v9  ;;  %v4017_v30 = vpop.f32.mrf.mxu0  ;;  %v5614_v58 = vadd.f32 %v1507_v61, %v1211_v60  ;;  %v3163_v9 = vsel %vm3156_vm5, %v3160_v32, %v3162_v37 }
 0x1b5   : > { %v1223_v7 = vpop.f32.mrf.mxu1 }
 0x1b6   : > { %v1224_v62 = vadd.f32 %v1223_v7, %v5492_v53  ;;  %v1523_v41 = vpop.f32.mrf.mxu0  ;;  %v5617_v31 = vadd.f32 %v4016_v0, %v1232_v1 }
 0x1b7   : > { %v3979_v47 = vpop.f32.mrf.mxu1 }
 0x1b8   : > { %v1235_v57 = vadd.f32 %v3979_v47, %v5503_v44  ;;  %v4020_v8 = vpop.f32.mrf.mxu0  ;;  %4235 = vmatmul.mubr.msk.bf16.vlgmr.msra.gmra.mxu0 %vm883_vm1, %v3161_v24  ;;  %v5623_v12 = vadd.f32 %v1520_v13, %v1224_v62  ;;  %v6266_v13 = vrot.slane %v4866_v23, 3 }
 0x1b9   : > { %v1226_v54 = vpop.f32.mrf.mxu1  ;;  %4238 = vmatprep.mubr.msk.bf16.mxu0 %vm883_vm1, %v3163_v9 }
 0x1ba   : > { %v1227_v53 = vadd.f32 %v1226_v54, %v5513_v21  ;;  %v1536_v61 = vpop.f32.mrf.mxu0  ;;  %v5627_v40 = vadd.f32 %v4017_v30, %v1235_v57  ;;  %v3165_v19 = vsel %vm3156_vm5, %v3162_v37, %v6266_v13  ;;  %v2835_v54 = vrot.slane %v6239_v5, 2 }
 0x1bb   : > { %v3982_v39 = vpop.f32.mrf.mxu1  ;;  %4197 = vmatmul.mubr.msk.bf16.vlgmr.msra.gmra.mxu1 %vm883_vm1, %v5144_v33 }
 0x1bc   : > { %v1248_v44 = vadd.f32 %v3982_v39, %v5519_v35  ;;  %4200 = vmatprep.mubr.msk.bf16.mxu1 %vm883_vm1, %v5159_v2  ;;  %v4021_v11 = vpop.f32.mrf.mxu0  ;;  %v5634_v25 = vadd.f32 %v1523_v41, %v1227_v53 }
 0x1bd   : > { %v1239_v0 = vpop.f32.mrf.mxu1 }
 0x1be   : > { %v1240_v42 = vadd.f32 %v1239_v0, %v5522_v27  ;;  %v1539_v59 = vpop.f32.mrf.mxu0  ;;  %v5637_v21 = vadd.f32 %v4020_v8, %v1248_v44 }
 0x1bf   : > { %v3983_v60 = vpop.f32.mrf.mxu1 }
 0x1c0   : > { %v1251_v33 = vadd.f32 %v3983_v60, %v5529_v43  ;;  %v4024_v35 = vpop.f32.mrf.mxu0  ;;  %4239 = vmatmul.mubr.msk.bf16.gmra.mxu0 %vm883_vm1, %v3165_v19  ;;  %v5644_v2 = vadd.f32 %v1536_v61, %v1240_v42  ;;  %v2832_v61 = vrot.slane %v4650_v18, 3  ;;  %v6270_v19 = vld [vmem:[#allocation12_spill] sm:$0xff] }
 0x1c1   : > { %v1242_v32 = vpop.f32.mrf.mxu1  ;;  %4242 = vmatprep.mubr.msk.bf16.mxu0 %vm883_vm1, %v5154_v26 }
 0x1c2   : > { %v1243_v27 = vadd.f32 %v1242_v32, %v5537_v36  ;;  %v1552_v1 = vpop.f32.mrf.mxu0  ;;  %v5649_v30 = vadd.f32 %v4021_v11, %v1251_v33  ;;  %v2839_v33 = vrot.slane %v6270_v19, 2  ;;  %v6280_v19 = vld [vmem:[#allocation31_spill] sm:$0xff] }
 0x1c3   : > { %v3986_v7 = vpop.f32.mrf.mxu1  ;;  %4201 = vmatmul.mubr.msk.bf16.gmra.mxu1 %vm883_vm1, %v5169_v10 }
 0x1c4   : > { %v1264_v23 = vadd.f32 %v3986_v7, %v5540_v16  ;;  %4204 = vmatprep.mubr.msk.bf16.mxu1 %vm883_vm1, %v5183_v46  ;;  %v4025_v43 = vpop.f32.mrf.mxu0  ;;  %v5656_v37 = vadd.f32 %v1539_v59, %v1243_v27  ;;  %v6269_v59 = vld [vmem:[#allocation3_spill] sm:$0xff] }
 0x1c5   : > { %v1255_v62 = vpop.f32.mrf.mxu1 }
 0x1c6   : > { %v1256_v26 = vadd.f32 %v1255_v62, %v5547_v15  ;;  %v1555_v41 = vpop.f32.mrf.mxu0  ;;  %v5659_v36 = vadd.f32 %v4024_v35, %v1264_v23  ;;  %v6271_v35 = vld [vmem:[#allocation2_spill] sm:$0xff]  ;;  %v6273_v23 = vld [vmem:[#allocation9_spill] sm:$0xff] }
 0x1c7   : > { %v3987_v47 = vpop.f32.mrf.mxu1 }
 0x1c8   : > { %v1267_v24 = vadd.f32 %v3987_v47, %v5554_v38  ;;  %v4028_v57 = vpop.f32.mrf.mxu0  ;;  %4243 = vmatmul.mubr.msk.bf16.gmra.mxu0 %vm883_vm1, %v5172_v56  ;;  %v5664_v10 = vadd.f32 %v1552_v1, %v1256_v26  ;;  %v3174_v38 = vrot.slane %v6222_v28, 3  ;;  %v2836_v56 = vrot.slane %v6240_v63, 3  ;;  %v6272_v1 = vld [vmem:[#allocation30_spill] sm:$0xff]  ;;  %v6274_v47 = vld [vmem:[#allocation7_spill] sm:$0xff] }
 0x1c9   : > { %v1258_v16 = vpop.f32.mrf.mxu1  ;;  %4246 = vmatprep.mubr.msk.bf16.mxu0 %vm883_vm1, %v5177_v6 }
 0x1ca   : > { %v1259_v46 = vadd.f32 %v1258_v16, %v5559_v51  ;;  %v1568_v8 = vpop.f32.mrf.mxu0  ;;  %v5669_v15 = vadd.f32 %v4025_v43, %v1267_v24  ;;  %v2831_v51 = vrot.slane %v6238_v52, 2  ;;  %v2837_v42 = vor.u32 %v2836_v56, %v2835_v54 }
 0x1cb   : > { %v3990_v9 = vpop.f32.mrf.mxu1  ;;  %4205 = vmatmul.mubr.msk.bf16.gmra.mxu1 %vm883_vm1, %v5192_v14  ;;  %v3172_v14 = vrot.slane %v6223_v49, 3  ;;  %v2840_v43 = vrot.slane %v6273_v23, 3  ;;  %v3176_v24 = vrot.slane %v6274_v47, 3  ;;  %v6283_v23 = vld [vmem:[#allocation17_spill] sm:$0xff] }
 0x1cc   : > { %v1280_v53 = vadd.f32 %v3990_v9, %v5451_v48  ;;  %4208 = vmatprep.mubr.msk.bf16.mxu1 %vm883_vm1, %v5198_v50  ;;  %v4029_v6 = vpop.f32.mrf.mxu0  ;;  %v5681_v39 = vadd.f32 %v1555_v41, %v1259_v46  ;;  %v6267_v48 = vld [vmem:[#allocation27_spill] sm:$0xff]  ;;  %v2833_v13 = vor.u32 %v2832_v61, %v2831_v51 }
 0x1cd   : > { %v1271_v44 = vpop.f32.mrf.mxu1  ;;  %v6268_v0 = vrot.slane %v6267_v48, 3  ;;  %v3175_v18 = vsel %vm3156_vm5, %v3172_v14, %v3174_v38  ;;  %v2841_v61 = vor.u32 %v2840_v43, %v2839_v33  ;;  %v3182_v43 = vrot.slane %v6283_v23, 3 }
 0x1ce   : > { %v1272_v28 = vadd.f32 %v1271_v44, %v5460_v22  ;;  %v1571_v5 = vpop.f32.mrf.mxu0  ;;  %v5685_v11 = vadd.f32 %v4028_v57, %v1280_v53  ;;  %v2834_v7 = vsel %vm2799_vm6, %v6272_v1, %v2833_v13  ;;  %v2838_v41 = vsel %vm2799_vm6, %v2833_v13, %v2837_v42  ;;  %v6275_v57 = vld [vmem:[#allocation4_spill] sm:$0xff]  ;;  %v6277_v53 = vld [vmem:[#allocation10_spill] sm:$0xff] }
 0x1cf   : > { %v3991_v63 = vpop.f32.mrf.mxu1  ;;  %v3173_v50 = vsel %vm3156_vm5, %v6268_v0, %v3172_v14  ;;  %v2846_v33 = vsel %vm2799_vm6, %v2841_v61, %v6280_v19 }
 0x1d0   : > { %v1283_v52 = vadd.f32 %v3991_v63, %v6269_v59  ;;  %v4032_v60 = vpop.f32.mrf.mxu0  ;;  %4247 = vmatmul.mubr.msk.bf16.gmra.mxu0 %vm883_vm1, %v3173_v50  ;;  %v5693_v49 = vadd.f32 %v1568_v8, %v1272_v28  ;;  %v6276_v8 = vld [vmem:[#allocation11_spill] sm:$0xff]  ;;  %v3177_v28 = vsel %vm3156_vm5, %v3174_v38, %v3176_v24  ;;  %v6278_v63 = vld [vmem:[#allocation13_spill] sm:$0xff] }
 0x1d1   : > { %v1274_v22 = vpop.f32.mrf.mxu1  ;;  %4250 = vmatprep.mubr.msk.bf16.mxu0 %vm883_vm1, %v3175_v18  ;;  %v3178_v9 = vrot.slane %v6276_v8, 3  ;;  %v6285_v8 = vld [vmem:[#allocation29_spill] sm:$0xff] }
 0x1d2   : > { %v1275_v32 = vadd.f32 %v1274_v22, %v6271_v35  ;;  %v1584_v27 = vpop.f32.mrf.mxu0  ;;  %v5701_v62 = vadd.f32 %v4029_v6, %v1283_v52  ;;  %v6279_v52 = vld [vmem:[#allocation16_spill] sm:$0xff]  ;;  %v6281_v35 = vld [vmem:[#allocation15_spill] sm:$0xff] }
 0x1d3   : > { %v3994_v26 = vpop.f32.mrf.mxu1  ;;  %4209 = vmatmul.mubr.msk.bf16.gmra.mxu1 %vm883_vm1, %v2834_v7  ;;  %v3179_v50 = vsel %vm3156_vm5, %v3176_v24, %v3178_v9 }
 0x1d4   : > { %v1296_v16 = vadd.f32 %v3994_v26, %v6275_v57  ;;  %4212 = vmatprep.mubr.msk.bf16.mxu1 %vm883_vm1, %v2838_v41  ;;  %v4033_v46 = vpop.f32.mrf.mxu0  ;;  %v5709_v54 = vadd.f32 %v1571_v5, %v1275_v32  ;;  %v3180_v32 = vrot.slane %v6281_v35, 3  ;;  %v6284_v41 = vld [vmem:[#allocation23_spill] sm:$0xff] }
 0x1d5   : > { %v1287_v56 = vpop.f32.mrf.mxu1 }
 0x1d6   : > { %v1288_v6 = vadd.f32 %v1287_v56, %v6277_v53  ;;  %v1587_v51 = vpop.f32.mrf.mxu0  ;;  %v5712_v44 = vadd.f32 %v4032_v60, %v1296_v16  ;;  %v2842_v60 = vsel %vm2799_vm6, %v2837_v42, %v2841_v61 }
 0x1d7   : > { %v3995_v14 = vpop.f32.mrf.mxu1 }
 0x1d8   : > { %v1299_v48 = vadd.f32 %v3995_v14, %v6278_v63  ;;  %v4036_v0 = vpop.f32.mrf.mxu0  ;;  %4251 = vmatmul.mubr.msk.bf16.gmra.mxu0 %vm883_vm1, %v3177_v28  ;;  %v5718_v59 = vadd.f32 %v1584_v27, %v1288_v6  ;;  %v6282_v27 = vld [vmem:[#allocation19_spill] sm:$0xff]  ;;  %v3183_v6 = vsel %vm3156_vm5, %v3180_v32, %v3182_v43  ;;  %v6286_v14 = vld [vmem:[#allocation5_spill] sm:$0xff] }
 0x1d9   : > { %v1290_v5 = vpop.f32.mrf.mxu1  ;;  %4254 = vmatprep.mubr.msk.bf16.mxu0 %vm883_vm1, %v3179_v50  ;;  %v6287_v50 = vld [vmem:[#allocation32_spill] sm:$0xff] }
 0x1da   : > { %v1291_v18 = vadd.f32 %v1290_v5, %v6279_v52  ;;  %v1600_v13 = vpop.f32.mrf.mxu0  ;;  %v5723_v22 = vadd.f32 %v4033_v46, %v1299_v48  ;;  %v3181_v46 = vsel %vm3156_vm5, %v3178_v9, %v3180_v32  ;;  %v6288_v9 = vld [vmem:[#allocation20_spill] sm:$0xff]  ;;  %v6292_v32 = vld [vmem:[#allocation6_spill] sm:$0xff] }
 0x1db   : > { %v3998_v38 = vpop.f32.mrf.mxu1  ;;  %4213 = vmatmul.mubr.msk.bf16.gmra.mxu1 %vm883_vm1, %v2842_v60  ;;  %v3184_v5 = vrot.slane %v6288_v9, 3  ;;  %v6289_v52 = vld [vmem:[#allocation8_spill] sm:$0xff]  ;;  %v6290_v60 = vld [vmem:[#allocation26_spill] sm:$0xff] }
 0x1dc   : > { %v1312_v1 = vadd.f32 %v3998_v38, %v6282_v27  ;;  %4216 = vmatprep.mubr.msk.bf16.mxu1 %vm883_vm1, %v2846_v33  ;;  %v4037_v7 = vpop.f32.mrf.mxu0  ;;  %v5732_v26 = vadd.f32 %v1587_v51, %v1291_v18  ;;  %v6291_v38 = vld [vmem:[#allocation24_spill] sm:$0xff] }
 0x1dd   : > { %v1303_v42 = vpop.f32.mrf.mxu1  ;;  %v3186_v19 = vrot.slane %v6291_v38, 3 }
 0x1de   : > { %v1304_v47 = vadd.f32 %v1303_v42, %v6284_v41  ;;  %v1603_v24 = vpop.f32.mrf.mxu0  ;;  %v5735_v57 = vadd.f32 %v4036_v0, %v1312_v1  ;;  %v3185_v42 = vsel %vm3156_vm5, %v3182_v43, %v3184_v5  ;;  %v6293_v41 = vld [vmem:[#allocation14_spill] sm:$0xff] }
 0x1df   : > { %v3999_v16 = vpop.f32.mrf.mxu1 }
 0x1e0   : > { %v1315_v56 = vadd.f32 %v3999_v16, %v6285_v8  ;;  %v4040_v53 = vpop.f32.mrf.mxu0  ;;  %4255 = vmatmul.mubr.msk.bf16.gmra.mxu0 %vm883_vm1, %v3181_v46  ;;  %v5741_v61 = vadd.f32 %v1600_v13, %v1304_v47  ;;  %v3187_v46 = vsel %vm3156_vm5, %v3184_v5, %v3186_v19 }
 0x1e1   : > { %v1306_v51 = vpop.f32.mrf.mxu1  ;;  %4258 = vmatprep.mubr.msk.bf16.mxu0 %vm883_vm1, %v3183_v6 }
 0x1e2   : > { %v1307_v28 = vadd.f32 %v1306_v51, %v6286_v14  ;;  %v1616_v63 = vpop.f32.mrf.mxu0  ;;  %v5745_v48 = vadd.f32 %v4037_v7, %v1315_v56  ;;  %v6294_v56 = vld [vmem:[#allocation18_spill] sm:$0xff] }
 0x1e3   : > { %v4002_v0 = vpop.f32.mrf.mxu1  ;;  %4217 = vmatmul.mubr.msk.bf16.gmra.mxu1 %vm883_vm1, %v6287_v50 }
 0x1e4   : > { %v1328_v18 = vadd.f32 %v4002_v0, %v6289_v52  ;;  %4220 = vmatprep.mubr.msk.bf16.mxu1 %vm883_vm1, %v6290_v60  ;;  %v4041_v13 = vpop.f32.mrf.mxu0  ;;  %v5754_v33 = vadd.f32 %v1603_v24, %v1307_v28  ;;  %v6295_v28 = vld [vmem:[#allocation33_spill] sm:$0xff]  ;;  %v6296_v0 = vld [vmem:[#allocation35_spill] sm:$0xff] }
 0x1e5   : > { %v1319_v35 = vpop.f32.mrf.mxu1 }
 0x1e6   : > { %v1320_v27 = vadd.f32 %v1319_v35, %v6292_v32  ;;  %v1619_v1 = vpop.f32.mrf.mxu0  ;;  %v5757_v7 = vadd.f32 %v4040_v53, %v1328_v18 }
 0x1e7   : > { %v4003_v23 = vpop.f32.mrf.mxu1 }
 0x1e8   : > { %v1331_v47 = vadd.f32 %v4003_v23, %v6293_v41  ;;  %v4084_v16 = vpop.f32.mrf.mxu0  ;;  %4259 = vmatmul.mubr.msk.bf16.gmra.mxu0 %vm883_vm1, %v3185_v42  ;;  %v5763_v8 = vadd.f32 %v1616_v63, %v1320_v27 }
 0x1e9   : > { %v1322_v24 = vpop.f32.mrf.mxu1  ;;  %4262 = vmatprep.mubr.msk.bf16.mxu0 %vm883_vm1, %v3187_v46 }
 0x1ea   : > { %v1323_v6 = vadd.f32 %v1322_v24, %v6294_v56  ;;  %v2075_v51 = vpop.f32.mrf.mxu0  ;;  %v5767_v53 = vadd.f32 %v4041_v13, %v1331_v47  ;;  %v6297_v13 = vrot.slane %v5018_v20, 3  ;;  %v6299_v20 = vld [vmem:[#allocation37_spill] sm:$0xff] }
 0x1eb   : > { %v4046_v14 = vpop.f32.mrf.mxu1  ;;  %4221 = vmatmul.mubr.msk.bf16.gmra.mxu1 %vm883_vm1, %v6295_v28  ;;  %v6301_v28 = vld [vmem:[#allocation36_spill] sm:$0xff] }
 0x1ec   : > { %v1861_v43 = vadd.f32 %v4046_v14, %v5573_v45  ;;  %4224 = vmatprep.mubr.msk.bf16.mxu1 %vm883_vm1, %v6296_v0  ;;  %v4085_v50 = vpop.f32.mrf.mxu0  ;;  %v5774_v63 = vadd.f32 %v1619_v1, %v1323_v6  ;;  %v3189_v38 = vsel %vm3156_vm5, %v3186_v19, %v6297_v13  ;;  %v6298_v1 = vld [vmem:[#allocation34_spill] sm:$0xff] }
 0x1ed   : > { %v1716_v9 = vpop.f32.mrf.mxu1  ;;  %v6300_v19 = vld [vmem:[#allocation38_spill] sm:$0xff] }
 0x1ee   : > { %v1859_v5 = vadd.f32 %v1716_v9, %v5580_v3  ;;  %v2078_v52 = vpop.f32.mrf.mxu0  ;;  %v5777_v18 = vadd.f32 %v4084_v16, %v1861_v43 }
 0x1ef   : > { %v4047_v60 = vpop.f32.mrf.mxu1 }
 0x1f0   : > { %v1862_v35 = vadd.f32 %v4047_v60, %v5585_v4  ;;  %v4088_v45 = vpop.f32.mrf.mxu0  ;;  %4263 = vmatmul.mubr.msk.bf16.gmra.mxu0 %vm883_vm1, %v3189_v38  ;;  %v5784_v32 = vadd.f32 %v2075_v51, %v1859_v5 }
 0x1f1   : > { %v1719_v27 = vpop.f32.mrf.mxu1  ;;  %4266 = vmatprep.mubr.msk.bf16.mxu0 %vm883_vm1, %v6298_v1 }
 0x1f2   : > { %v1860_v3 = vadd.f32 %v1719_v27, %v5591_v29  ;;  %v2091_v23 = vpop.f32.mrf.mxu0  ;;  %v5789_v42 = vadd.f32 %v4085_v50, %v1862_v35 }
 0x1f3   : > { %v4050_v41 = vpop.f32.mrf.mxu1  ;;  %4225 = vmatmul.mubr.msk.bf16.gmra.mxu1 %vm883_vm1, %v6299_v20 }
 0x1f4   : > { %v1865_v4 = vadd.f32 %v4050_v41, %v5595_v17  ;;  %4228 = vmatprep.mubr.msk.bf16.mxu1 %vm883_vm1, %v6300_v19  ;;  %v4089_v47 = vpop.f32.mrf.mxu0  ;;  %v5796_v16 = vadd.f32 %v2078_v52, %v1860_v3 }
 0x1f5   : > { %v1732_v46 = vpop.f32.mrf.mxu1 }
 0x1f6   : > { %v1863_v24 = vadd.f32 %v1732_v46, %v5601_v55  ;;  %v2094_v56 = vpop.f32.mrf.mxu0  ;;  %v5799_v29 = vadd.f32 %v4088_v45, %v1865_v4  ;;  %v6302_v55 = vld [vmem:[#allocation39_spill] sm:$0xff] }
 0x1f7   : > { %v4051_v6 = vpop.f32.mrf.mxu1 }
 0x1f8   : > { %v1866_v51 = vadd.f32 %v4051_v6, %v5605_v34  ;;  %v4092_v14 = vpop.f32.mrf.mxu0  ;;  %4267 = vmatmul.mubr.msk.bf16.gmra.mxu0 %vm883_vm1, %v6301_v28  ;;  %v5804_v17 = vadd.f32 %v2091_v23, %v1863_v24 }
 0x1f9   : > { %v1735_v43 = vpop.f32.mrf.mxu1 }
 0x1fa   : > { %v1864_v0 = vadd.f32 %v1735_v43, %v5614_v58  ;;  %v2107_v50 = vpop.f32.mrf.mxu0  ;;  %v5807_v9 = vadd.f32 %v4089_v47, %v1866_v51 }
 0x1fb   : > { %v4054_v5 = vpop.f32.mrf.mxu1  ;;  %4229 = vmatmul.mubr.msk.bf16.gmra.mxu1 %vm883_vm1, %v6302_v55 }
 0x1fc   : > { %v1869_v52 = vadd.f32 %v4054_v5, %v5617_v31  ;;  %v4093_v60 = vpop.f32.mrf.mxu0  ;;  %v5812_v34 = vadd.f32 %v2094_v56, %v1864_v0 }
 0x1fd   : > { %v1748_v13 = vpop.f32.mrf.mxu1 }
 0x1fe   : > { %v1867_v38 = vadd.f32 %v1748_v13, %v5623_v12  ;;  %v2110_v35 = vpop.f32.mrf.mxu0  ;;  %v5815_v45 = vadd.f32 %v4092_v14, %v1869_v52 }
 0x1ff   : > { %v4055_v27 = vpop.f32.mrf.mxu1 }
 0x200   : > { %v1870_v58 = vadd.f32 %v4055_v27, %v5627_v40  ;;  %v4096_v1 = vpop.f32.mrf.mxu0  ;;  %v5818_v3 = vadd.f32 %v2107_v50, %v1867_v38 }
 0x201   : > { %v1751_v23 = vpop.f32.mrf.mxu1 }
 0x202   : > { %v1868_v41 = vadd.f32 %v1751_v23, %v5634_v25  ;;  %v2123_v20 = vpop.f32.mrf.mxu0  ;;  %v5821_v31 = vadd.f32 %v4093_v60, %v1870_v58 }
 0x203   : > { %v4058_v4 = vpop.f32.mrf.mxu1 }
 0x204   : > { %v1873_v19 = vadd.f32 %v4058_v4, %v5637_v21  ;;  %v4097_v47 = vpop.f32.mrf.mxu0  ;;  %v5824_v12 = vadd.f32 %v2110_v35, %v1868_v41 }
 0x205   : > { %v1764_v46 = vpop.f32.mrf.mxu1 }
 0x206   : > { %v1871_v24 = vadd.f32 %v1764_v46, %v5644_v2  ;;  %v2126_v56 = vpop.f32.mrf.mxu0  ;;  %v5827_v40 = vadd.f32 %v4096_v1, %v1873_v19 }
 0x207   : > { %v4059_v6 = vpop.f32.mrf.mxu1 }
 0x208   : > { %v1874_v51 = vadd.f32 %v4059_v6, %v5649_v30  ;;  %v4100_v14 = vpop.f32.mrf.mxu0  ;;  %v5830_v25 = vadd.f32 %v2123_v20, %v1871_v24 }
 0x209   : > { %v1767_v28 = vpop.f32.mrf.mxu1 }
 0x20a   : > { %v1872_v43 = vadd.f32 %v1767_v28, %v5656_v37  ;;  %v2139_v0 = vpop.f32.mrf.mxu0  ;;  %v5833_v21 = vadd.f32 %v4097_v47, %v1874_v51 }
 0x20b   : > { %v4062_v50 = vpop.f32.mrf.mxu1 }
 0x20c   : > { %v1877_v5 = vadd.f32 %v4062_v50, %v5659_v36  ;;  %v4101_v55 = vpop.f32.mrf.mxu0  ;;  %v5836_v2 = vadd.f32 %v2126_v56, %v1872_v43 }
 0x20d   : > { %v1780_v52 = vpop.f32.mrf.mxu1 }
 0x20e   : > { %v1875_v60 = vadd.f32 %v1780_v52, %v5664_v10  ;;  %v2142_v13 = vpop.f32.mrf.mxu0  ;;  %v5839_v30 = vadd.f32 %v4100_v14, %v1877_v5 }
 0x20f   : > { %v4063_v38 = vpop.f32.mrf.mxu1 }
 0x210   : > { %v1878_v35 = vadd.f32 %v4063_v38, %v5669_v15  ;;  %v4104_v27 = vpop.f32.mrf.mxu0  ;;  %v5842_v37 = vadd.f32 %v2139_v0, %v1875_v60 }
 0x211   : > { %v1783_v58 = vpop.f32.mrf.mxu1 }
 0x212   : > { %v1876_v1 = vadd.f32 %v1783_v58, %v5681_v39  ;;  %v2155_v23 = vpop.f32.mrf.mxu0  ;;  %v5845_v36 = vadd.f32 %v4101_v55, %v1878_v35 }
 0x213   : > { %v4066_v41 = vpop.f32.mrf.mxu1 }
 0x214   : > { %v1881_v20 = vadd.f32 %v4066_v41, %v5685_v11  ;;  %v4105_v4 = vpop.f32.mrf.mxu0  ;;  %v5848_v10 = vadd.f32 %v2142_v13, %v1876_v1 }
 0x215   : > { %v1796_v19 = vpop.f32.mrf.mxu1 }
 0x216   : > { %v1879_v47 = vadd.f32 %v1796_v19, %v5693_v49  ;;  %v2158_v46 = vpop.f32.mrf.mxu0  ;;  %v5851_v15 = vadd.f32 %v4104_v27, %v1881_v20 }
 0x217   : > { %v4067_v24 = vpop.f32.mrf.mxu1 }
 0x218   : > { %v1882_v56 = vadd.f32 %v4067_v24, %v5701_v62  ;;  %v4108_v6 = vpop.f32.mrf.mxu0  ;;  %v5854_v39 = vadd.f32 %v2155_v23, %v1879_v47 }
 0x219   : > { %v1799_v51 = vpop.f32.mrf.mxu1 }
 0x21a   : > { %v1880_v14 = vadd.f32 %v1799_v51, %v5709_v54  ;;  %v2171_v28 = vpop.f32.mrf.mxu0  ;;  %v5857_v11 = vadd.f32 %v4105_v4, %v1882_v56 }
 0x21b   : > { %v4070_v43 = vpop.f32.mrf.mxu1 }
 0x21c   : > { %v1885_v0 = vadd.f32 %v4070_v43, %v5712_v44  ;;  %v4109_v50 = vpop.f32.mrf.mxu0  ;;  %v5860_v49 = vadd.f32 %v2158_v46, %v1880_v14 }
 0x21d   : > { %v1812_v5 = vpop.f32.mrf.mxu1 }
 0x21e   : > { %v1883_v55 = vadd.f32 %v1812_v5, %v5718_v59  ;;  %v2174_v52 = vpop.f32.mrf.mxu0  ;;  %v5863_v62 = vadd.f32 %v4108_v6, %v1885_v0 }
 0x21f   : > { %v4071_v60 = vpop.f32.mrf.mxu1 }
 0x220   : > { %v1886_v13 = vadd.f32 %v4071_v60, %v5723_v22  ;;  %v4112_v38 = vpop.f32.mrf.mxu0  ;;  %v5866_v54 = vadd.f32 %v2171_v28, %v1883_v55 }
 0x221   : > { %v1815_v35 = vpop.f32.mrf.mxu1 }
 0x222   : > { %v1884_v27 = vadd.f32 %v1815_v35, %v5732_v26  ;;  %v2187_v58 = vpop.f32.mrf.mxu0  ;;  %v5869_v44 = vadd.f32 %v4109_v50, %v1886_v13 }
 0x223   : > { %v4074_v1 = vpop.f32.mrf.mxu1 }
 0x224   : > { %v1889_v23 = vadd.f32 %v4074_v1, %v5735_v57  ;;  %v4113_v41 = vpop.f32.mrf.mxu0  ;;  %v5872_v59 = vadd.f32 %v2174_v52, %v1884_v27 }
 0x225   : > { %v1828_v20 = vpop.f32.mrf.mxu1 }
 0x226   : > { %v1887_v4 = vadd.f32 %v1828_v20, %v5741_v61  ;;  %v2190_v19 = vpop.f32.mrf.mxu0  ;;  %v5875_v22 = vadd.f32 %v4112_v38, %v1889_v23 }
 0x227   : > { %v4075_v47 = vpop.f32.mrf.mxu1 }
 0x228   : > { %v1890_v46 = vadd.f32 %v4075_v47, %v5745_v48  ;;  %v4116_v24 = vpop.f32.mrf.mxu0  ;;  %v5878_v26 = vadd.f32 %v2187_v58, %v1887_v4 }
 0x229   : > { %v1831_v56 = vpop.f32.mrf.mxu1 }
 0x22a   : > { %v1888_v6 = vadd.f32 %v1831_v56, %v5754_v33  ;;  %v2203_v51 = vpop.f32.mrf.mxu0  ;;  %v5881_v57 = vadd.f32 %v4113_v41, %v1890_v46 }
 0x22b   : > { %v4078_v14 = vpop.f32.mrf.mxu1 }
 0x22c   : > { %v1893_v28 = vadd.f32 %v4078_v14, %v5757_v7  ;;  %v4117_v43 = vpop.f32.mrf.mxu0  ;;  %v5884_v61 = vadd.f32 %v2190_v19, %v1888_v6 }
 0x22d   : > { %v1844_v0 = vpop.f32.mrf.mxu1 }
 0x22e   : > { %v1891_v50 = vadd.f32 %v1844_v0, %v5763_v8  ;;  %v2206_v5 = vpop.f32.mrf.mxu0  ;;  %v5887_v48 = vadd.f32 %v4116_v24, %v1893_v28 }
 0x22f   : > { %v4079_v55 = vpop.f32.mrf.mxu1 }
 0x230   : > { %v1894_v52 = vadd.f32 %v4079_v55, %v5767_v53  ;;  %v4160_v60 = vpop.f32.mrf.mxu0  ;;  %v5890_v33 = vadd.f32 %v2203_v51, %v1891_v50 }
 0x231   : > { %v1847_v13 = vpop.f32.mrf.mxu1 }
 0x232   : > { %v1892_v38 = vadd.f32 %v1847_v13, %v5774_v63  ;;  %v2617_v35 = vpop.f32.mrf.mxu0  ;;  %v5893_v7 = vadd.f32 %v4117_v43, %v1894_v52 }
 0x233   : > { %v4122_v27 = vpop.f32.mrf.mxu1 }
 0x234   : > { %v2534_v58 = vadd.f32 %v4122_v27, %v5777_v18  ;;  %v4161_v1 = vpop.f32.mrf.mxu0  ;;  %v5896_v8 = vadd.f32 %v2206_v5, %v1892_v38 }
 0x235   : > { %v2389_v23 = vpop.f32.mrf.mxu1 }
 0x236   : > { %v2532_v41 = vadd.f32 %v2389_v23, %v5784_v32  ;;  %v2620_v20 = vpop.f32.mrf.mxu0  ;;  %v5899_v53 = vadd.f32 %v4160_v60, %v2534_v58 }
 0x237   : > { %v4123_v4 = vpop.f32.mrf.mxu1 }
 0x238   : > { %v2535_v19 = vadd.f32 %v4123_v4, %v5789_v42  ;;  %v4164_v47 = vpop.f32.mrf.mxu0  ;;  %v5902_v63 = vadd.f32 %v2617_v35, %v2532_v41 }
 0x239   : > { %v2392_v46 = vpop.f32.mrf.mxu1 }
 0x23a   : > { %v2533_v24 = vadd.f32 %v2392_v46, %v5796_v16  ;;  %v2633_v56 = vpop.f32.mrf.mxu0  ;;  %v5905_v18 = vadd.f32 %v4161_v1, %v2535_v19 }
 0x23b   : > { %v4126_v6 = vpop.f32.mrf.mxu1 }
 0x23c   : > { %v2538_v51 = vadd.f32 %v4126_v6, %v5799_v29  ;;  %v4165_v14 = vpop.f32.mrf.mxu0  ;;  %v5908_v32 = vadd.f32 %v2620_v20, %v2533_v24 }
 0x23d   : > { %v2405_v28 = vpop.f32.mrf.mxu1 }
 0x23e   : > { %v2536_v43 = vadd.f32 %v2405_v28, %v5804_v17  ;;  %v2636_v0 = vpop.f32.mrf.mxu0  ;;  %v5911_v42 = vadd.f32 %v4164_v47, %v2538_v51 }
 0x23f   : > { %v4127_v50 = vpop.f32.mrf.mxu1 }
 0x240   : > { %v2539_v5 = vadd.f32 %v4127_v50, %v5807_v9  ;;  %v4168_v55 = vpop.f32.mrf.mxu0  ;;  %v5914_v16 = vadd.f32 %v2633_v56, %v2536_v43 }
 0x241   : > { %v2408_v52 = vpop.f32.mrf.mxu1 }
 0x242   : > { %v2537_v60 = vadd.f32 %v2408_v52, %v5812_v34  ;;  %v2649_v13 = vpop.f32.mrf.mxu0  ;;  %v5917_v29 = vadd.f32 %v4165_v14, %v2539_v5 }
 0x243   : > { %v4130_v38 = vpop.f32.mrf.mxu1 }
 0x244   : > { %v2542_v35 = vadd.f32 %v4130_v38, %v5815_v45  ;;  %v4169_v27 = vpop.f32.mrf.mxu0  ;;  %v5920_v17 = vadd.f32 %v2636_v0, %v2537_v60 }
 0x245   : > { %v2421_v58 = vpop.f32.mrf.mxu1 }
 0x246   : > { %v2540_v1 = vadd.f32 %v2421_v58, %v5818_v3  ;;  %v2652_v23 = vpop.f32.mrf.mxu0  ;;  %v5923_v9 = vadd.f32 %v4168_v55, %v2542_v35 }
 0x247   : > { %v4131_v41 = vpop.f32.mrf.mxu1 }
 0x248   : > { %v2543_v20 = vadd.f32 %v4131_v41, %v5821_v31  ;;  %v4172_v4 = vpop.f32.mrf.mxu0  ;;  %v5926_v34 = vadd.f32 %v2649_v13, %v2540_v1 }
 0x249   : > { %v2424_v19 = vpop.f32.mrf.mxu1 }
 0x24a   : > { %v2541_v47 = vadd.f32 %v2424_v19, %v5824_v12  ;;  %v2665_v46 = vpop.f32.mrf.mxu0  ;;  %v5929_v45 = vadd.f32 %v4169_v27, %v2543_v20 }
 0x24b   : > { %v4134_v24 = vpop.f32.mrf.mxu1 }
 0x24c   : > { %v2546_v56 = vadd.f32 %v4134_v24, %v5827_v40  ;;  %v4173_v6 = vpop.f32.mrf.mxu0  ;;  %v5932_v3 = vadd.f32 %v2652_v23, %v2541_v47 }
 0x24d   : > { %v2437_v51 = vpop.f32.mrf.mxu1 }
 0x24e   : > { %v2544_v14 = vadd.f32 %v2437_v51, %v5830_v25  ;;  %v2668_v28 = vpop.f32.mrf.mxu0  ;;  %v5935_v31 = vadd.f32 %v4172_v4, %v2546_v56 }
 0x24f   : > { %v4135_v43 = vpop.f32.mrf.mxu1 }
 0x250   : > { %v2547_v0 = vadd.f32 %v4135_v43, %v5833_v21  ;;  %v4176_v50 = vpop.f32.mrf.mxu0  ;;  %v5938_v12 = vadd.f32 %v2665_v46, %v2544_v14 }
 0x251   : > { %v2440_v5 = vpop.f32.mrf.mxu1 }
 0x252   : > { %v2545_v55 = vadd.f32 %v2440_v5, %v5836_v2  ;;  %v2681_v52 = vpop.f32.mrf.mxu0  ;;  %v5941_v40 = vadd.f32 %v4173_v6, %v2547_v0 }
 0x253   : > { %v4138_v60 = vpop.f32.mrf.mxu1 }
 0x254   : > { %v2550_v13 = vadd.f32 %v4138_v60, %v5839_v30  ;;  %v4177_v38 = vpop.f32.mrf.mxu0  ;;  %v5944_v25 = vadd.f32 %v2668_v28, %v2545_v55 }
 0x255   : > { %v2453_v35 = vpop.f32.mrf.mxu1 }
 0x256   : > { %v2548_v27 = vadd.f32 %v2453_v35, %v5842_v37  ;;  %v2684_v58 = vpop.f32.mrf.mxu0  ;;  %v5947_v21 = vadd.f32 %v4176_v50, %v2550_v13 }
 0x257   : > { %v4139_v1 = vpop.f32.mrf.mxu1 }
 0x258   : > { %v2551_v23 = vadd.f32 %v4139_v1, %v5845_v36  ;;  %v4180_v41 = vpop.f32.mrf.mxu0  ;;  %v5950_v2 = vadd.f32 %v2681_v52, %v2548_v27 }
 0x259   : > { %v2456_v20 = vpop.f32.mrf.mxu1 }
 0x25a   : > { %v2549_v4 = vadd.f32 %v2456_v20, %v5848_v10  ;;  %v2697_v19 = vpop.f32.mrf.mxu0  ;;  %v5953_v30 = vadd.f32 %v4177_v38, %v2551_v23 }
 0x25b   : > { %v4142_v47 = vpop.f32.mrf.mxu1 }
 0x25c   : > { %v2554_v46 = vadd.f32 %v4142_v47, %v5851_v15  ;;  %v4181_v24 = vpop.f32.mrf.mxu0  ;;  %v5956_v37 = vadd.f32 %v2684_v58, %v2549_v4 }
 0x25d   : > { %v2469_v56 = vpop.f32.mrf.mxu1 }
 0x25e   : > { %v2552_v6 = vadd.f32 %v2469_v56, %v5854_v39  ;;  %v2700_v51 = vpop.f32.mrf.mxu0  ;;  %v5959_v36 = vadd.f32 %v4180_v41, %v2554_v46 }
 0x25f   : > { %v4143_v14 = vpop.f32.mrf.mxu1 }
 0x260   : > { %v2555_v28 = vadd.f32 %v4143_v14, %v5857_v11  ;;  %v4184_v43 = vpop.f32.mrf.mxu0  ;;  %v5962_v10 = vadd.f32 %v2697_v19, %v2552_v6 }
 0x261   : > { %v2472_v0 = vpop.f32.mrf.mxu1 }
 0x262   : > { %v2553_v50 = vadd.f32 %v2472_v0, %v5860_v49  ;;  %v2713_v5 = vpop.f32.mrf.mxu0  ;;  %v5965_v15 = vadd.f32 %v4181_v24, %v2555_v28 }
 0x263   : > { %v4146_v55 = vpop.f32.mrf.mxu1 }
 0x264   : > { %v2558_v52 = vadd.f32 %v4146_v55, %v5863_v62  ;;  %v4185_v60 = vpop.f32.mrf.mxu0  ;;  %v5968_v39 = vadd.f32 %v2700_v51, %v2553_v50 }
 0x265   : > { %v2485_v13 = vpop.f32.mrf.mxu1 }
 0x266   : > { %v2556_v38 = vadd.f32 %v2485_v13, %v5866_v54  ;;  %v2716_v35 = vpop.f32.mrf.mxu0  ;;  %v5971_v11 = vadd.f32 %v4184_v43, %v2558_v52 }
 0x267   : > { %v4147_v27 = vpop.f32.mrf.mxu1 }
 0x268   : > { %v2559_v58 = vadd.f32 %v4147_v27, %v5869_v44  ;;  %v4188_v1 = vpop.f32.mrf.mxu0  ;;  %v5974_v49 = vadd.f32 %v2713_v5, %v2556_v38 }
 0x269   : > { %v2488_v23 = vpop.f32.mrf.mxu1 }
 0x26a   : > { %v2557_v41 = vadd.f32 %v2488_v23, %v5872_v59  ;;  %v2729_v20 = vpop.f32.mrf.mxu0  ;;  %v5977_v62 = vadd.f32 %v4185_v60, %v2559_v58 }
 0x26b   : > { %v4150_v4 = vpop.f32.mrf.mxu1 }
 0x26c   : > { %v2562_v19 = vadd.f32 %v4150_v4, %v5875_v22  ;;  %v4189_v47 = vpop.f32.mrf.mxu0  ;;  %v5980_v54 = vadd.f32 %v2716_v35, %v2557_v41 }
 0x26d   : > { %v2501_v46 = vpop.f32.mrf.mxu1 }
 0x26e   : > { %v2560_v24 = vadd.f32 %v2501_v46, %v5878_v26  ;;  %v2732_v56 = vpop.f32.mrf.mxu0  ;;  %v5983_v44 = vadd.f32 %v4188_v1, %v2562_v19 }
 0x26f   : > { %v4151_v6 = vpop.f32.mrf.mxu1 }
 0x270   : > { %v2563_v51 = vadd.f32 %v4151_v6, %v5881_v57  ;;  %v4192_v14 = vpop.f32.mrf.mxu0  ;;  %v5986_v59 = vadd.f32 %v2729_v20, %v2560_v24 }
 0x271   : > { %v2504_v28 = vpop.f32.mrf.mxu1 }
 0x272   : > { %v2561_v43 = vadd.f32 %v2504_v28, %v5884_v61  ;;  %v2745_v22 = vpop.f32.mrf.mxu0  ;;  %v5989_v0 = vadd.f32 %v4189_v47, %v2563_v51 }
 0x273   : > { %v4154_v50 = vpop.f32.mrf.mxu1 }
 0x274   : > { %v2566_v5 = vadd.f32 %v4154_v50, %v5887_v48  ;;  %v4193_v26 = vpop.f32.mrf.mxu0  ;;  %v5992_v55 = vadd.f32 %v2732_v56, %v2561_v43 }
 0x275   : > { %v2517_v52 = vpop.f32.mrf.mxu1 }
 0x276   : > { %v2564_v60 = vadd.f32 %v2517_v52, %v5890_v33  ;;  %v2748_v57 = vpop.f32.mrf.mxu0  ;;  %v5995_v13 = vadd.f32 %v4192_v14, %v2566_v5 }
 0x277   : > { %v4155_v38 = vpop.f32.mrf.mxu1 }
 0x278   : > { %v2567_v35 = vadd.f32 %v4155_v38, %v5893_v7  ;;  %v4236_v61 = vpop.f32.mrf.mxu0  ;;  %v5998_v27 = vadd.f32 %v2745_v22, %v2564_v60 }
 0x279   : > { %v2520_v58 = vpop.f32.mrf.mxu1 }
 0x27a   : > { %v2565_v1 = vadd.f32 %v2520_v58, %v5896_v8  ;;  %v3288_v48 = vpop.f32.mrf.mxu0  ;;  %v6002_v23 = vadd.f32 %v4193_v26, %v2567_v35 }
 0x27b   : > { %v4198_v41 = vpop.f32.mrf.mxu1 }
 0x27c   : > { %v3119_v20 = vadd.f32 %v4198_v41, %v5899_v53  ;;  %v4237_v33 = vpop.f32.mrf.mxu0  ;;  %v6005_v4 = vadd.f32 %v2748_v57, %v2565_v1 }
 0x27d   : > { %v2974_v7 = vpop.f32.mrf.mxu1 }
 0x27e   : > { %v3433_v8 = vadd.f32 %v4236_v61, %v3119_v20  ;;  %v3117_v19 = vadd.f32 %v2974_v7, %v5902_v63  ;;  %v3291_v47 = vpop.f32.mrf.mxu0 }
 0x27f   : > { %v4199_v46 = vpop.f32.mrf.mxu1 }
 0x280   : > { %3470 = vst.msk [vmem:[%s6010_s16 + $0x10] sm:$0xff] %vm3467_vm7, %v3433_v8  ;;  %v3431_v53 = vadd.f32 %v3288_v48, %v3117_v19  ;;  %v3120_v24 = vadd.f32 %v4199_v46, %v5905_v18  ;;  %v4240_v56 = vpop.f32.mrf.mxu0 }
 0x281   : > { %v2977_v6 = vpop.f32.mrf.mxu1 }
 0x282   : > { %3468 = vst.msk [vmem:[%s6010_s16] sm:$0xff] %vm3467_vm7, %v3431_v53  ;;  %v3434_v51 = vadd.f32 %v4237_v33, %v3120_v24  ;;  %v3118_v14 = vadd.f32 %v2977_v6, %v5908_v32  ;;  %v3304_v28 = vpop.f32.mrf.mxu0 }
 0x283   : > { %v4202_v43 = vpop.f32.mrf.mxu1 }
 0x284   : > { %3471 = vst.msk [vmem:[%s6010_s16 + $0x18] sm:$0xff] %vm3467_vm7, %v3434_v51  ;;  %v3432_v63 = vadd.f32 %v3291_v47, %v3118_v14  ;;  %v3123_v22 = vadd.f32 %v4202_v43, %v5911_v42  ;;  %v4241_v50 = vpop.f32.mrf.mxu0 }
 0x285   : > { %v2990_v5 = vpop.f32.mrf.mxu1 }
 0x286   : > { %3469 = vst.msk [vmem:[%s6010_s16 + $0x8] sm:$0xff] %vm3467_vm7, %v3432_v63  ;;  %v3437_v18 = vadd.f32 %v4240_v56, %v3123_v22  ;;  %v3121_v26 = vadd.f32 %v2990_v5, %v5914_v16  ;;  %v3307_v52 = vpop.f32.mrf.mxu0 }
 0x287   : > { %v4203_v60 = vpop.f32.mrf.mxu1 }
 0x288   : > { %3474 = vst.msk [vmem:[%s6010_s16 + $0x30] sm:$0xff] %vm3467_vm7, %v3437_v18  ;;  %v3435_v32 = vadd.f32 %v3304_v28, %v3121_v26  ;;  %v3124_v57 = vadd.f32 %v4203_v60, %v5917_v29  ;;  %v4244_v38 = vpop.f32.mrf.mxu0 }
 0x289   : > { %v2993_v35 = vpop.f32.mrf.mxu1 }
 0x28a   : > { %3472 = vst.msk [vmem:[%s6010_s16 + $0x20] sm:$0xff] %vm3467_vm7, %v3435_v32  ;;  %v3438_v42 = vadd.f32 %v4241_v50, %v3124_v57  ;;  %v3122_v61 = vadd.f32 %v2993_v35, %v5920_v17  ;;  %v3320_v58 = vpop.f32.mrf.mxu0 }
 0x28b   : > { %v4206_v1 = vpop.f32.mrf.mxu1 }
 0x28c   : > { %3475 = vst.msk [vmem:[%s6010_s16 + $0x38] sm:$0xff] %vm3467_vm7, %v3438_v42  ;;  %v3436_v16 = vadd.f32 %v3307_v52, %v3122_v61  ;;  %v3127_v48 = vadd.f32 %v4206_v1, %v5923_v9  ;;  %v4245_v41 = vpop.f32.mrf.mxu0 }
 0x28d   : > { %v3006_v20 = vpop.f32.mrf.mxu1 }
 0x28e   : > { %3473 = vst.msk [vmem:[%s6010_s16 + $0x28] sm:$0xff] %vm3467_vm7, %v3436_v16  ;;  %v3441_v29 = vadd.f32 %v4244_v38, %v3127_v48  ;;  %v3125_v33 = vadd.f32 %v3006_v20, %v5926_v34  ;;  %v3323_v7 = vpop.f32.mrf.mxu0 }
 0x28f   : > { %v4207_v8 = vpop.f32.mrf.mxu1 }
 0x290   : > { %3478 = vst.msk [vmem:[%s6010_s16 + $0x50] sm:$0xff] %vm3467_vm7, %v3441_v29  ;;  %v3439_v17 = vadd.f32 %v3320_v58, %v3125_v33  ;;  %v3128_v19 = vadd.f32 %v4207_v8, %v5929_v45  ;;  %v4248_v47 = vpop.f32.mrf.mxu0 }
 0x291   : > { %v3009_v46 = vpop.f32.mrf.mxu1 }
 0x292   : > { %3476 = vst.msk [vmem:[%s6010_s16 + $0x40] sm:$0xff] %vm3467_vm7, %v3439_v17  ;;  %v3442_v9 = vadd.f32 %v4245_v41, %v3128_v19  ;;  %v3126_v53 = vadd.f32 %v3009_v46, %v5932_v3  ;;  %v3336_v24 = vpop.f32.mrf.mxu0 }
 0x293   : > { %v4210_v56 = vpop.f32.mrf.mxu1 }
 0x294   : > { %3479 = vst.msk [vmem:[%s6010_s16 + $0x58] sm:$0xff] %vm3467_vm7, %v3442_v9  ;;  %v3440_v34 = vadd.f32 %v3323_v7, %v3126_v53  ;;  %v3131_v6 = vadd.f32 %v4210_v56, %v5935_v31  ;;  %v4249_v51 = vpop.f32.mrf.mxu0 }
 0x295   : > { %v3022_v14 = vpop.f32.mrf.mxu1 }
 0x296   : > { %3477 = vst.msk [vmem:[%s6010_s16 + $0x48] sm:$0xff] %vm3467_vm7, %v3440_v34  ;;  %v3445_v45 = vadd.f32 %v4248_v47, %v3131_v6  ;;  %v3129_v28 = vadd.f32 %v3022_v14, %v5938_v12  ;;  %v3339_v43 = vpop.f32.mrf.mxu0 }
 0x297   : > { %v4211_v63 = vpop.f32.mrf.mxu1 }
 0x298   : > { %3482 = vst.msk [vmem:[%s6010_s16 + $0x70] sm:$0xff] %vm3467_vm7, %v3445_v45  ;;  %v3443_v3 = vadd.f32 %v3336_v24, %v3129_v28  ;;  %v3132_v22 = vadd.f32 %v4211_v63, %v5941_v40  ;;  %v4252_v50 = vpop.f32.mrf.mxu0 }
 0x299   : > { %v3025_v5 = vpop.f32.mrf.mxu1 }
 0x29a   : > { %3480 = vst.msk [vmem:[%s6010_s16 + $0x60] sm:$0xff] %vm3467_vm7, %v3443_v3  ;;  %v3446_v31 = vadd.f32 %v4249_v51, %v3132_v22  ;;  %v3130_v18 = vadd.f32 %v3025_v5, %v5944_v25  ;;  %v3352_v26 = vpop.f32.mrf.mxu0 }
 0x29b   : > { %v4214_v52 = vpop.f32.mrf.mxu1 }
 0x29c   : > { %3483 = vst.msk [vmem:[%s6010_s16 + $0x78] sm:$0xff] %vm3467_vm7, %v3446_v31  ;;  %v3444_v12 = vadd.f32 %v3339_v43, %v3130_v18  ;;  %v3135_v60 = vadd.f32 %v4214_v52, %v5947_v21  ;;  %v4253_v32 = vpop.f32.mrf.mxu0 }
 0x29d   : > { %v3038_v57 = vpop.f32.mrf.mxu1 }
 0x29e   : > { %3481 = vst.msk [vmem:[%s6010_s16 + $0x68] sm:$0xff] %vm3467_vm7, %v3444_v12  ;;  %v3449_v40 = vadd.f32 %v4252_v50, %v3135_v60  ;;  %v3133_v38 = vadd.f32 %v3038_v57, %v5950_v2  ;;  %v3355_v35 = vpop.f32.mrf.mxu0 }
 0x29f   : > { %v4215_v42 = vpop.f32.mrf.mxu1 }
 0x2a0   : > { %3486 = vst.msk [vmem:[%s6010_s16 + $0x90] sm:$0xff] %vm3467_vm7, %v3449_v40  ;;  %v3447_v25 = vadd.f32 %v3352_v26, %v3133_v38  ;;  %v3136_v61 = vadd.f32 %v4215_v42, %v5953_v30  ;;  %v4256_v58 = vpop.f32.mrf.mxu0 }
 0x2a1   : > { %v3041_v1 = vpop.f32.mrf.mxu1 }
 0x2a2   : > { %3484 = vst.msk [vmem:[%s6010_s16 + $0x80] sm:$0xff] %vm3467_vm7, %v3447_v25  ;;  %v3450_v21 = vadd.f32 %v4253_v32, %v3136_v61  ;;  %v3134_v16 = vadd.f32 %v3041_v1, %v5956_v37  ;;  %v3368_v48 = vpop.f32.mrf.mxu0 }
 0x2a3   : > { %v4218_v41 = vpop.f32.mrf.mxu1 }
 0x2a4   : > { %3487 = vst.msk [vmem:[%s6010_s16 + $0x98] sm:$0xff] %vm3467_vm7, %v3450_v21  ;;  %v3448_v2 = vadd.f32 %v3355_v35, %v3134_v16  ;;  %v3139_v20 = vadd.f32 %v4218_v41, %v5959_v36  ;;  %v4257_v29 = vpop.f32.mrf.mxu0 }
 0x2a5   : > { %v3054_v33 = vpop.f32.mrf.mxu1 }
 0x2a6   : > { %3485 = vst.msk [vmem:[%s6010_s16 + $0x88] sm:$0xff] %vm3467_vm7, %v3448_v2  ;;  %v3453_v30 = vadd.f32 %v4256_v58, %v3139_v20  ;;  %v3137_v7 = vadd.f32 %v3054_v33, %v5962_v10  ;;  %v3371_v8 = vpop.f32.mrf.mxu0 }
 0x2a7   : > { %v4219_v17 = vpop.f32.mrf.mxu1 }
 0x2a8   : > { %3490 = vst.msk [vmem:[%s6010_s16 + $0xb0] sm:$0xff] %vm3467_vm7, %v3453_v30  ;;  %v3451_v37 = vadd.f32 %v3368_v48, %v3137_v7  ;;  %v3140_v19 = vadd.f32 %v4219_v17, %v5965_v15  ;;  %v4260_v47 = vpop.f32.mrf.mxu0 }
 0x2a9   : > { %v3057_v46 = vpop.f32.mrf.mxu1 }
 0x2aa   : > { %3488 = vst.msk [vmem:[%s6010_s16 + $0xa0] sm:$0xff] %vm3467_vm7, %v3451_v37  ;;  %v3454_v36 = vadd.f32 %v4257_v29, %v3140_v19  ;;  %v3138_v9 = vadd.f32 %v3057_v46, %v5968_v39  ;;  %v3384_v53 = vpop.f32.mrf.mxu0 }
 0x2ab   : > { %v4222_v24 = vpop.f32.mrf.mxu1 }
 0x2ac   : > { %3491 = vst.msk [vmem:[%s6010_s16 + $0xb8] sm:$0xff] %vm3467_vm7, %v3454_v36  ;;  %v3452_v10 = vadd.f32 %v3371_v8, %v3138_v9  ;;  %v3143_v56 = vadd.f32 %v4222_v24, %v5971_v11  ;;  %v4261_v34 = vpop.f32.mrf.mxu0 }
 0x2ad   : > { %v3070_v6 = vpop.f32.mrf.mxu1 }
 0x2ae   : > { %3489 = vst.msk [vmem:[%s6010_s16 + $0xa8] sm:$0xff] %vm3467_vm7, %v3452_v10  ;;  %v3457_v15 = vadd.f32 %v4260_v47, %v3143_v56  ;;  %v3141_v51 = vadd.f32 %v3070_v6, %v5974_v49  ;;  %v3387_v14 = vpop.f32.mrf.mxu0 }
 0x2af   : > { %v4223_v45 = vpop.f32.mrf.mxu1 }
 0x2b0   : > { %3494 = vst.msk [vmem:[%s6010_s16 + $0xd0] sm:$0xff] %vm3467_vm7, %v3457_v15  ;;  %v3455_v39 = vadd.f32 %v3384_v53, %v3141_v51  ;;  %v3144_v28 = vadd.f32 %v4223_v45, %v5977_v62  ;;  %v4264_v43 = vpop.f32.mrf.mxu0 }
 0x2b1   : > { %v3073_v63 = vpop.f32.mrf.mxu1 }
 0x2b2   : > { %3492 = vst.msk [vmem:[%s6010_s16 + $0xc0] sm:$0xff] %vm3467_vm7, %v3455_v39  ;;  %v3458_v11 = vadd.f32 %v4261_v34, %v3144_v28  ;;  %v3142_v3 = vadd.f32 %v3073_v63, %v5980_v54  ;;  %v3400_v22 = vpop.f32.mrf.mxu0 }
 0x2b3   : > { %v4226_v50 = vpop.f32.mrf.mxu1 }
 0x2b4   : > { %3495 = vst.msk [vmem:[%s6010_s16 + $0xd8] sm:$0xff] %vm3467_vm7, %v3458_v11  ;;  %v3456_v49 = vadd.f32 %v3387_v14, %v3142_v3  ;;  %v3147_v5 = vadd.f32 %v4226_v50, %v5983_v44  ;;  %v4265_v31 = vpop.f32.mrf.mxu0 }
 0x2b5   : > { %v3086_v18 = vpop.f32.mrf.mxu1 }
 0x2b6   : > { %3493 = vst.msk [vmem:[%s6010_s16 + $0xc8] sm:$0xff] %vm3467_vm7, %v3456_v49  ;;  %v3461_v62 = vadd.f32 %v4264_v43, %v3147_v5  ;;  %v3145_v26 = vadd.f32 %v3086_v18, %v5986_v59  ;;  %v3403_v52 = vpop.f32.mrf.mxu0 }
 0x2b7   : > { %v4227_v12 = vpop.f32.mrf.mxu1 }
 0x2b8   : > { %3498 = vst.msk [vmem:[%s6010_s16 + $0xf0] sm:$0xff] %vm3467_vm7, %v3461_v62  ;;  %v3459_v54 = vadd.f32 %v3400_v22, %v3145_v26  ;;  %v3148_v60 = vadd.f32 %v4227_v12, %v5989_v0  ;;  %v4268_v32 = vpop.f32.mrf.mxu0 }
 0x2b9   : > { %v3089_v57 = vpop.f32.mrf.mxu1 }
 0x2ba   : > { %3496 = vst.msk [vmem:[%s6010_s16 + $0xe0] sm:$0xff] %vm3467_vm7, %v3459_v54  ;;  %v3462_v44 = vadd.f32 %v4265_v31, %v3148_v60  ;;  %v3146_v40 = vadd.f32 %v3089_v57, %v5992_v55  ;;  %v3416_v35 = vpop.f32.mrf.mxu0 }
 0x2bb   : > { %v4230_v38 = vpop.f32.mrf.mxu1 }
 0x2bc   : > { %3499 = vst.msk [vmem:[%s6010_s16 + $0xf8] sm:$0xff] %vm3467_vm7, %v3462_v44  ;;  %v3460_v59 = vadd.f32 %v3403_v52, %v3146_v40  ;;  %v3151_v42 = vadd.f32 %v4230_v38, %v5995_v13  ;;  %v4269_v58 = vpop.f32.mrf.mxu0 }
 0x2bd   : > { %v3102_v25 = vpop.f32.mrf.mxu1 }
 0x2be   : > { %3497 = vst.msk [vmem:[%s6010_s16 + $0xe8] sm:$0xff] %vm3467_vm7, %v3460_v59  ;;  %v3465_v0 = vadd.f32 %v4268_v32, %v3151_v42  ;;  %v3149_v61 = vadd.f32 %v3102_v25, %v5998_v27  ;;  %v3419_v41 = vpop.f32.mrf.mxu0 }
 0x2bf   : > { %v4231_v1 = vpop.f32.mrf.mxu1 }
 0x2c0   : > { %3502 = vst.msk [vmem:[%s6010_s16 + $0x110] sm:$0xff] %vm3467_vm7, %v3465_v0  ;;  %v3463_v55 = vadd.f32 %v3416_v35, %v3149_v61  ;;  %v3152_v21 = vadd.f32 %v4231_v1, %v6002_v23 }
 0x2c1   : > { %v3105_v16 = vpop.f32.mrf.mxu1 }
 0x2c2   : > { %3500 = vst.msk [vmem:[%s6010_s16 + $0x100] sm:$0xff] %vm3467_vm7, %v3463_v55  ;;  %v3466_v48 = vadd.f32 %v4269_v58, %v3152_v21  ;;  %v3150_v13 = vadd.f32 %v3105_v16, %v6005_v4 }
 0x2c4   : > { %3503 = vst.msk [vmem:[%s6010_s16 + $0x118] sm:$0xff] %vm3467_vm7, %v3466_v48  ;;  %v3464_v2 = vadd.f32 %v3419_v41, %v3150_v13 }
 0x2c6   : > { %3501 = vst.msk [vmem:[%s6010_s16 + $0x108] sm:$0xff] %vm3467_vm7, %v3464_v2 }
 0x2c7 PF: > { %s15_s18 = sadd.s32 1, %s4300_s18  }
 0x2c8   : > { %p12_p4 = scmp.ge.s32.totalorder %s15_s18, 4  }
 0x2ca   :  { %14 = sbr.rel (!%p12_p4) target bundleno = 1 (0x1), region = 78 }

</bundles_post_ra>
